<compile_context>
chip_gen: v6e
topology: v6e:2x2x1
jax: 0.10.0
libtpu: 0.0.40
codegen_flags: <defaults>
</compile_context>

<pallas_src>
import math
import jax
import jax.numpy as jnp
from jax.experimental import pallas as pl
from jax.experimental.pallas import tpu as pltpu

# ---- small, module-consistent shapes -------------------------------------------------
B, M, DIN = 8, 16, 32        # batch, ROI nodes averaged over (dim=1), input feature dim
H1, H2 = 64, 64              # hidden_dims
D = 16                       # latent_dim
C = 4                        # output_dim (classes)
K = 8                        # n_density (radial flow length)
BN_EPS = 1e-5
LOG_2PI = math.log(2.0 * math.pi)
LANES = 128                  # lane-dense output width; wrapper slices [:, :C]


def posterior_net_kernel(
    x_ref,                 # (B*M, DIN)
    w1_ref, b1_ref,        # (DIN, H1), (1, H1)
    w2_ref, b2_ref,        # (H1, H2),  (1, H2)
    w3_ref, b3_ref,        # (H2, D),   (1, D)
    avg_ref,               # (B*C, B*M)  class-tiled node-averaging matrix (rows sum to 1)
    gamma_ref, beta_ref,   # (1, D)      BatchNorm affine params
    z0_ref,                # (K, B*C, D) per-step radial-flow centers (row b*C+c -> class c)
    fa_ref, fb_ref,        # (K, B*C, 1) per-step flow alpha / beta (pre-broadcast)
    en_ref,                # (B*C, LANES) scatter constant: En[b*C+c, c] = N[c], else 0
    p_ref,                 # (B, B*C)     class-group pooling: P[b, b*C+c] = 1
    alpha_out_ref,         # (B, LANES) f32 ; alpha occupies lanes [0, C)
):
    # ---- encoder: Linear-ReLU-Linear-ReLU-[node mean folded]-Linear (MXU) ----
    x = x_ref[...]
    h = jnp.dot(x, w1_ref[...], preferred_element_type=jnp.float32) + b1_ref[...]
    h = jnp.maximum(h, 0.0)
    h = jnp.dot(h, w2_ref[...], preferred_element_type=jnp.float32) + b2_ref[...]
    h = jnp.maximum(h, 0.0)
    # mean over dim=1 folded through the last linear; avg_ref rows are also tiled C
    # times so the latent comes out already replicated per class (row b*C+c = zk[b]).
    pooled = jnp.dot(avg_ref[...], h, preferred_element_type=jnp.float32)            # (B*C, H2)
    z = jnp.dot(pooled, w3_ref[...], preferred_element_type=jnp.float32) + b3_ref[...]  # (B*C, D)

    # ---- BatchNorm1d(latent_dim), training-mode batch statistics (biased var) ----
    # Each sample appears exactly C times, so mean / biased variance over the tiled
    # rows equal the per-batch statistics.
    mu = jnp.mean(z, axis=0, keepdims=True)
    var = jnp.mean((z - mu) ** 2, axis=0, keepdims=True)
    z = (z - mu) * jax.lax.rsqrt(var + BN_EPS) * gamma_ref[...] + beta_ref[...]

    # ---- radial normalizing flow, vectorized over (batch, class) on a (B*C, D) slab ----
    sum_ldj = jnp.zeros((B * C, 1), jnp.float32)
    for k in range(K):                       # K sequential flow steps (unrolled)
        a_f = fa_ref[k]                      # (B*C, 1)
        b_f = fb_ref[k]                      # (B*C, 1)
        diff = z - z0_ref[k]                 # (B*C, D)
        r = jnp.sqrt(jnp.sum(diff * diff, axis=-1, keepdims=True))   # (B*C, 1)
        h_r = 1.0 / (a_f + r)
        beta_h = b_f * h_r
        # log|det J| = (D-1)*log(1 + b*h) + log(1 + b*h - b*h^2*r)
        #            = (D-1)*log(1 + b*h) + log(1 + b*h*(a*h))        (folded form)
        sum_ldj = sum_ldj + (D - 1) * jnp.log(1.0 + beta_h) \
                          + jnp.log(1.0 + beta_h * (a_f * h_r))
        z = z + beta_h * diff

    # standard-normal base log-density + accumulated log-det
    log_q = (-0.5 * D * LOG_2PI
             - 0.5 * jnp.sum(z * z, axis=-1, keepdims=True)
             + sum_ldj)                                               # (B*C, 1)

    # alpha[b, c] = 1 + N[c] * exp(log_q[b*C+c]); scattered into a lane-dense (B, LANES)
    # slab with one lane-broadcast multiply + one tiny matmul (no relayout, unmasked store).
    q = jnp.exp(log_q)                                                # (B*C, 1)
    scattered = en_ref[...] * q                                       # (B*C, LANES)
    alpha_out_ref[...] = 1.0 + jnp.dot(p_ref[...], scattered,
                                       preferred_element_type=jnp.float32)


def prepare_constants(params):
    """One-time precomputation of kernel constants from the module parameters."""
    (w1, b1, w2, b2, w3, b3, gamma, beta, z0_flat,
     alpha_prime, beta_prime, n_vec) = params

    # pyro-style radial-flow reparameterization (deterministic param transform)
    flow_alpha = jax.nn.softplus(alpha_prime)               # (C, K)
    flow_beta = -flow_alpha + jax.nn.softplus(beta_prime)   # (C, K)

    # node-averaging (mean over dim=1), tiled C times along rows so the latent comes
    # out already replicated per class (row b*C+c = zk[b]).
    avg = jnp.kron(jnp.eye(B, dtype=jnp.float32),
                   jnp.full((1, M), 1.0 / M, dtype=jnp.float32))      # (B, B*M)
    avg_t = jnp.repeat(avg, C, axis=0)                                # (B*C, B*M)

    # per-step flow constants broadcast onto the (B*C,) row layout (row b*C+c -> class c)
    fa_bc = jnp.tile(flow_alpha, (B, 1))                              # (B*C, K)
    fb_bc = jnp.tile(flow_beta, (B, 1))
    fa_steps = jnp.transpose(fa_bc, (1, 0))[:, :, None]               # (K, B*C, 1)
    fb_steps = jnp.transpose(fb_bc, (1, 0))[:, :, None]               # (K, B*C, 1)

    z0_kcd = jnp.transpose(z0_flat.reshape(C, K, D), (1, 0, 2))       # (K, C, D)
    z0_steps = jnp.tile(z0_kcd, (1, B, 1))                            # (K, B*C, D)

    # scatter constants: En[b*C+c, c] = N[c] (zeros elsewhere); P[b, b*C+c] = 1
    lane_iota = jnp.arange(LANES, dtype=jnp.int32)[None, :]
    class_iota = jnp.arange(C, dtype=jnp.int32)[:, None]
    en_c = jnp.where(lane_iota == class_iota, n_vec[:, None], 0.0).astype(jnp.float32)  # (C, LANES)
    en = jnp.tile(en_c, (B, 1))                                       # (B*C, LANES)
    p_mat = jnp.kron(jnp.eye(B, dtype=jnp.float32),
                     jnp.ones((1, C), dtype=jnp.float32))             # (B, B*C)

    return (w1, b1, w2, b2, w3, b3, avg_t, gamma, beta,
            z0_steps, fa_steps, fb_steps, en, p_mat)


@jax.jit
def posterior_network_forward(x, consts):
    (w1, b1, w2, b2, w3, b3, avg_t, gamma, beta,
     z0_steps, fa_steps, fb_steps, en, p_mat) = consts
    x2d = x.reshape(B * M, DIN)

    vmem = pl.BlockSpec(memory_space=pltpu.MemorySpace.VMEM)
    alpha_pad = pl.pallas_call(
        posterior_net_kernel,
        out_shape=jax.ShapeDtypeStruct((B, LANES), jnp.float32),
        in_specs=[vmem] * 15,
        out_specs=vmem,
        compiler_params=pltpu.CompilerParams(vmem_limit_bytes=8 * 1024 * 1024),
    )(x2d, w1, b1, w2, b2, w3, b3, avg_t, gamma, beta,
      z0_steps, fa_steps, fb_steps, en, p_mat)

    alpha = alpha_pad[:, :C]
    # predict = argmax(F.normalize(alpha, p=1, dim=1)) == argmax(alpha) since alpha > 0
    pred = jnp.argmax(alpha, axis=-1).astype(jnp.int32)
    return alpha, pred


# ---- pure-JAX reference (original un-folded math / op order) --------------------------
def reference_forward(x, params):
    (w1, b1, w2, b2, w3, b3, gamma, beta, z0_flat,
     alpha_prime, beta_prime, n_vec) = params
    flow_alpha = jax.nn.softplus(alpha_prime)
    flow_beta = -flow_alpha + jax.nn.softplus(beta_prime)
    h = jnp.maximum(x.reshape(B * M, DIN) @ w1 + b1, 0.0)
    h = jnp.maximum(h @ w2 + b2, 0.0)
    z_all = h @ w3 + b3
    zk = z_all.reshape(B, M, D).mean(axis=1)
    mu = zk.mean(axis=0, keepdims=True)
    var = ((zk - mu) ** 2).mean(axis=0, keepdims=True)
    zk = (zk - mu) / jnp.sqrt(var + BN_EPS) * gamma + beta
    alphas = []
    for c in range(C):
        z = zk
        sum_ldj = jnp.zeros((B, 1), jnp.float32)
        for k in range(K):
            a_f = flow_alpha[c, k]
            b_f = flow_beta[c, k]
            z0 = z0_flat[c * K + k][None, :]
            diff = z - z0
            r = jnp.sqrt(jnp.sum(diff * diff, axis=-1, keepdims=True))
            h_r = 1.0 / (a_f + r)
            beta_h = b_f * h_r
            sum_ldj += (D - 1) * jnp.log(1.0 + beta_h) \
                + jnp.log(1.0 + beta_h - b_f * h_r * h_r * r)
            z = z + beta_h * diff
        log_q = -0.5 * D * LOG_2PI - 0.5 * jnp.sum(z * z, -1, keepdims=True) + sum_ldj
        alphas.append(1.0 + n_vec[c] * jnp.exp(log_q))
    alpha = jnp.concatenate(alphas, axis=-1)
    soft = alpha / jnp.sum(jnp.abs(alpha), -1, keepdims=True)
    return alpha, jnp.argmax(soft, axis=-1).astype(jnp.int32)


if __name__ == "__main__":
    key = jax.random.PRNGKey(0)
    ks = jax.random.split(key, 12)

    x = jax.random.normal(ks[0], (B, M, DIN), jnp.float32)

    w1 = jax.random.normal(ks[1], (DIN, H1), jnp.float32) / math.sqrt(DIN)
    b1 = jax.random.normal(ks[2], (1, H1), jnp.float32) * 0.01
    w2 = jax.random.normal(ks[3], (H1, H2), jnp.float32) / math.sqrt(H1)
    b2 = jax.random.normal(ks[4], (1, H2), jnp.float32) * 0.01
    w3 = jax.random.normal(ks[5], (H2, D), jnp.float32) / math.sqrt(H2)
    b3 = jax.random.normal(ks[6], (1, D), jnp.float32) * 0.01

    gamma = 1.0 + 0.1 * jax.random.normal(ks[7], (1, D), jnp.float32)
    beta = 0.1 * jax.random.normal(ks[8], (1, D), jnp.float32)

    z0_flat = 0.5 * jax.random.normal(ks[9], (C * K, D), jnp.float32)
    alpha_prime = 0.3 * jax.random.normal(ks[10], (C, K), jnp.float32)
    beta_prime = 0.3 * jax.random.normal(ks[11], (C, K), jnp.float32)

    # class counts N, budget_function='id'
    n_vec = jnp.array([3.0e6, 2.0e6, 4.0e6, 1.0e6], jnp.float32)

    params = (w1, b1, w2, b2, w3, b3, gamma, beta, z0_flat,
              alpha_prime, beta_prime, n_vec)

    consts = prepare_constants(params)          # one-time constant prep (hoisted)
    alpha_out, pred_out = posterior_network_forward(x, consts)
    jax.block_until_ready((alpha_out, pred_out))

    alpha_ref, pred_ref = reference_forward(x, params)
    assert jnp.allclose(alpha_out, alpha_ref, rtol=1e-4, atol=1e-4), "alpha mismatch"
    assert jnp.array_equal(pred_out, pred_ref), "prediction mismatch"

    # TODO(synk): GCN / Transformer encoder branches, 'parametrized' budget, eval-mode
    # BatchNorm running stats, and non-default flow types (iaf/planar/batched/mixture)
    # are not implemented.
    print("KERNEL_OK")
</pallas_src>

<mosaic_0001>
module attributes {stable_mosaic.version = 11 : i64} {
  func.func @posterior_net_kernel(%arg0: memref<128x32xf32, #tpu.memory_space<vmem>>, %arg1: memref<32x64xf32, #tpu.memory_space<vmem>>, %arg2: memref<1x64xf32, #tpu.memory_space<vmem>>, %arg3: memref<64x64xf32, #tpu.memory_space<vmem>>, %arg4: memref<1x64xf32, #tpu.memory_space<vmem>>, %arg5: memref<64x16xf32, #tpu.memory_space<vmem>>, %arg6: memref<1x16xf32, #tpu.memory_space<vmem>>, %arg7: memref<32x128xf32, #tpu.memory_space<vmem>>, %arg8: memref<1x16xf32, #tpu.memory_space<vmem>>, %arg9: memref<1x16xf32, #tpu.memory_space<vmem>>, %arg10: memref<8x32x16xf32, #tpu.memory_space<vmem>>, %arg11: memref<8x32x1xf32, #tpu.memory_space<vmem>>, %arg12: memref<8x32x1xf32, #tpu.memory_space<vmem>>, %arg13: memref<32x128xf32, #tpu.memory_space<vmem>>, %arg14: memref<8x32xf32, #tpu.memory_space<vmem>>, %arg15: memref<8x128xf32, #tpu.memory_space<vmem>>) attributes {dimension_semantics = [], scalar_prefetch = 0 : i64, scratch_operands = 0 : i64, tpu.core_type = #tpu.core_type<tc>} {
    %c0 = arith.constant 0 : index
    %c0_0 = arith.constant 0 : index
    %0 = vector.load %arg0[%c0, %c0_0] : memref<128x32xf32, #tpu.memory_space<vmem>>, vector<128x32xf32>
    %c0_1 = arith.constant 0 : index
    %c0_2 = arith.constant 0 : index
    %1 = vector.load %arg1[%c0_1, %c0_2] : memref<32x64xf32, #tpu.memory_space<vmem>>, vector<32x64xf32>
    %cst = arith.constant dense<0.000000e+00> : vector<128x64xf32>
    %2 = tpu.matmul %0, %1, %cst {dimension_numbers = #tpu.dot_dimension_numbers<[1], [0], [0], [1], [0, 0, 1, 1], [], []>} : vector<128x32xf32>, vector<32x64xf32>, vector<128x64xf32> -> vector<128x64xf32>
    %c0_3 = arith.constant 0 : index
    %c0_4 = arith.constant 0 : index
    %3 = vector.load %arg2[%c0_3, %c0_4] : memref<1x64xf32, #tpu.memory_space<vmem>>, vector<1x64xf32>
    %4 = vector.broadcast %3 : vector<1x64xf32> to vector<128x64xf32>
    %5 = arith.addf %2, %4 : vector<128x64xf32>
    %cst_5 = arith.constant 0.000000e+00 : f32
    %6 = vector.broadcast %cst_5 : f32 to vector<128x64xf32>
    %7 = arith.maximumf %5, %6 : vector<128x64xf32>
    %c0_6 = arith.constant 0 : index
    %c0_7 = arith.constant 0 : index
    %8 = vector.load %arg3[%c0_6, %c0_7] : memref<64x64xf32, #tpu.memory_space<vmem>>, vector<64x64xf32>
    %cst_8 = arith.constant dense<0.000000e+00> : vector<128x64xf32>
    %9 = tpu.matmul %7, %8, %cst_8 {dimension_numbers = #tpu.dot_dimension_numbers<[1], [0], [0], [1], [0, 0, 1, 1], [], []>} : vector<128x64xf32>, vector<64x64xf32>, vector<128x64xf32> -> vector<128x64xf32>
    %c0_9 = arith.constant 0 : index
    %c0_10 = arith.constant 0 : index
    %10 = vector.load %arg4[%c0_9, %c0_10] : memref<1x64xf32, #tpu.memory_space<vmem>>, vector<1x64xf32>
    %11 = vector.broadcast %10 : vector<1x64xf32> to vector<128x64xf32>
    %12 = arith.addf %9, %11 : vector<128x64xf32>
    %cst_11 = arith.constant 0.000000e+00 : f32
    %13 = vector.broadcast %cst_11 : f32 to vector<128x64xf32>
    %14 = arith.maximumf %12, %13 : vector<128x64xf32>
    %c0_12 = arith.constant 0 : index
    %c0_13 = arith.constant 0 : index
    %15 = vector.load %arg7[%c0_12, %c0_13] : memref<32x128xf32, #tpu.memory_space<vmem>>, vector<32x128xf32>
    %cst_14 = arith.constant dense<0.000000e+00> : vector<32x64xf32>
    %16 = tpu.matmul %15, %14, %cst_14 {dimension_numbers = #tpu.dot_dimension_numbers<[1], [0], [0], [1], [0, 0, 1, 1], [], []>} : vector<32x128xf32>, vector<128x64xf32>, vector<32x64xf32> -> vector<32x64xf32>
    %c0_15 = arith.constant 0 : index
    %c0_16 = arith.constant 0 : index
    %17 = vector.load %arg5[%c0_15, %c0_16] : memref<64x16xf32, #tpu.memory_space<vmem>>, vector<64x16xf32>
    %cst_17 = arith.constant dense<0.000000e+00> : vector<32x16xf32>
    %18 = tpu.matmul %16, %17, %cst_17 {dimension_numbers = #tpu.dot_dimension_numbers<[1], [0], [0], [1], [0, 0, 1, 1], [], []>} : vector<32x64xf32>, vector<64x16xf32>, vector<32x16xf32> -> vector<32x16xf32>
    %c0_18 = arith.constant 0 : index
    %c0_19 = arith.constant 0 : index
    %19 = vector.load %arg6[%c0_18, %c0_19] : memref<1x16xf32, #tpu.memory_space<vmem>>, vector<1x16xf32>
    %20 = vector.broadcast %19 : vector<1x16xf32> to vector<32x16xf32>
    %21 = arith.addf %18, %20 : vector<32x16xf32>
    %cst_20 = arith.constant dense<0.000000e+00> : vector<16xf32>
    %22 = vector.multi_reduction <add>, %21, %cst_20 [0] : vector<32x16xf32> to vector<16xf32>
    %23 = vector.shape_cast %22 : vector<16xf32> to vector<1x16xf32>
    %cst_21 = arith.constant 3.200000e+01 : f32
    %24 = vector.broadcast %cst_21 : f32 to vector<1x16xf32>
    %25 = arith.divf %23, %24 : vector<1x16xf32>
    %26 = vector.broadcast %25 : vector<1x16xf32> to vector<32x16xf32>
    %27 = arith.subf %21, %26 : vector<32x16xf32>
    %28 = arith.mulf %27, %27 : vector<32x16xf32>
    %cst_22 = arith.constant dense<0.000000e+00> : vector<16xf32>
    %29 = vector.multi_reduction <add>, %28, %cst_22 [0] : vector<32x16xf32> to vector<16xf32>
    %30 = vector.shape_cast %29 : vector<16xf32> to vector<1x16xf32>
    %cst_23 = arith.constant 3.200000e+01 : f32
    %31 = vector.broadcast %cst_23 : f32 to vector<1x16xf32>
    %32 = arith.divf %30, %31 : vector<1x16xf32>
    %33 = vector.broadcast %25 : vector<1x16xf32> to vector<32x16xf32>
    %34 = arith.subf %21, %33 : vector<32x16xf32>
    %cst_24 = arith.constant 9.99999974E-6 : f32
    %35 = vector.broadcast %cst_24 : f32 to vector<1x16xf32>
    %36 = arith.addf %32, %35 : vector<1x16xf32>
    %37 = math.rsqrt %36 : vector<1x16xf32>
    %38 = vector.broadcast %37 : vector<1x16xf32> to vector<32x16xf32>
    %39 = arith.mulf %34, %38 : vector<32x16xf32>
    %c0_25 = arith.constant 0 : index
    %c0_26 = arith.constant 0 : index
    %40 = vector.load %arg8[%c0_25, %c0_26] : memref<1x16xf32, #tpu.memory_space<vmem>>, vector<1x16xf32>
    %41 = vector.broadcast %40 : vector<1x16xf32> to vector<32x16xf32>
    %42 = arith.mulf %39, %41 : vector<32x16xf32>
    %c0_27 = arith.constant 0 : index
    %c0_28 = arith.constant 0 : index
    %43 = vector.load %arg9[%c0_27, %c0_28] : memref<1x16xf32, #tpu.memory_space<vmem>>, vector<1x16xf32>
    %44 = vector.broadcast %43 : vector<1x16xf32> to vector<32x16xf32>
    %45 = arith.addf %42, %44 : vector<32x16xf32>
    %cst_29 = arith.constant 0.000000e+00 : f32
    %46 = vector.broadcast %cst_29 : f32 to vector<32x1xf32>
    %c0_30 = arith.constant 0 : index
    %c0_31 = arith.constant 0 : index
    %c0_32 = arith.constant 0 : index
    %47 = vector.load %arg11[%c0_30, %c0_31, %c0_32] : memref<8x32x1xf32, #tpu.memory_space<vmem>>, vector<1x32x1xf32>
    %48 = vector.shape_cast %47 : vector<1x32x1xf32> to vector<32x1xf32>
    %c0_33 = arith.constant 0 : index
    %c0_34 = arith.constant 0 : index
    %c0_35 = arith.constant 0 : index
    %49 = vector.load %arg12[%c0_33, %c0_34, %c0_35] : memref<8x32x1xf32, #tpu.memory_space<vmem>>, vector<1x32x1xf32>
    %50 = vector.shape_cast %49 : vector<1x32x1xf32> to vector<32x1xf32>
    %c0_36 = arith.constant 0 : index
    %c0_37 = arith.constant 0 : index
    %c0_38 = arith.constant 0 : index
    %51 = vector.load %arg10[%c0_36, %c0_37, %c0_38] : memref<8x32x16xf32, #tpu.memory_space<vmem>>, vector<1x32x16xf32>
    %52 = vector.shape_cast %51 : vector<1x32x16xf32> to vector<32x16xf32>
    %53 = arith.subf %45, %52 : vector<32x16xf32>
    %54 = arith.mulf %53, %53 : vector<32x16xf32>
    %cst_39 = arith.constant dense<0.000000e+00> : vector<32xf32>
    %55 = vector.multi_reduction <add>, %54, %cst_39 [1] : vector<32x16xf32> to vector<32xf32>
    %56 = vector.shape_cast %55 : vector<32xf32> to vector<32x1xf32>
    %57 = math.sqrt %56 : vector<32x1xf32>
    %58 = arith.addf %48, %57 : vector<32x1xf32>
    %cst_40 = arith.constant 1.000000e+00 : f32
    %59 = vector.broadcast %cst_40 : f32 to vector<32x1xf32>
    %60 = arith.divf %59, %58 : vector<32x1xf32>
    %61 = arith.mulf %50, %60 : vector<32x1xf32>
    %cst_41 = arith.constant 1.000000e+00 : f32
    %62 = vector.broadcast %cst_41 : f32 to vector<32x1xf32>
    %63 = arith.addf %62, %61 : vector<32x1xf32>
    %64 = math.log %63 : vector<32x1xf32>
    %cst_42 = arith.constant 1.500000e+01 : f32
    %65 = vector.broadcast %cst_42 : f32 to vector<32x1xf32>
    %66 = arith.mulf %65, %64 : vector<32x1xf32>
    %67 = arith.addf %46, %66 : vector<32x1xf32>
    %68 = arith.mulf %48, %60 : vector<32x1xf32>
    %69 = arith.mulf %61, %68 : vector<32x1xf32>
    %cst_43 = arith.constant 1.000000e+00 : f32
    %70 = vector.broadcast %cst_43 : f32 to vector<32x1xf32>
    %71 = arith.addf %70, %69 : vector<32x1xf32>
    %72 = math.log %71 : vector<32x1xf32>
    %73 = arith.addf %67, %72 : vector<32x1xf32>
    %74 = vector.broadcast %61 : vector<32x1xf32> to vector<32x16xf32>
    %75 = arith.mulf %74, %53 : vector<32x16xf32>
    %76 = arith.addf %45, %75 : vector<32x16xf32>
    %c1 = arith.constant 1 : index
    %c0_44 = arith.constant 0 : index
    %c0_45 = arith.constant 0 : index
    %77 = vector.load %arg11[%c1, %c0_44, %c0_45] : memref<8x32x1xf32, #tpu.memory_space<vmem>>, vector<1x32x1xf32>
    %78 = vector.shape_cast %77 : vector<1x32x1xf32> to vector<32x1xf32>
    %c1_46 = arith.constant 1 : index
    %c0_47 = arith.constant 0 : index
    %c0_48 = arith.constant 0 : index
    %79 = vector.load %arg12[%c1_46, %c0_47, %c0_48] : memref<8x32x1xf32, #tpu.memory_space<vmem>>, vector<1x32x1xf32>
    %80 = vector.shape_cast %79 : vector<1x32x1xf32> to vector<32x1xf32>
    %c1_49 = arith.constant 1 : index
    %c0_50 = arith.constant 0 : index
    %c0_51 = arith.constant 0 : index
    %81 = vector.load %arg10[%c1_49, %c0_50, %c0_51] : memref<8x32x16xf32, #tpu.memory_space<vmem>>, vector<1x32x16xf32>
    %82 = vector.shape_cast %81 : vector<1x32x16xf32> to vector<32x16xf32>
    %83 = arith.subf %76, %82 : vector<32x16xf32>
    %84 = arith.mulf %83, %83 : vector<32x16xf32>
    %cst_52 = arith.constant dense<0.000000e+00> : vector<32xf32>
    %85 = vector.multi_reduction <add>, %84, %cst_52 [1] : vector<32x16xf32> to vector<32xf32>
    %86 = vector.shape_cast %85 : vector<32xf32> to vector<32x1xf32>
    %87 = math.sqrt %86 : vector<32x1xf32>
    %88 = arith.addf %78, %87 : vector<32x1xf32>
    %cst_53 = arith.constant 1.000000e+00 : f32
    %89 = vector.broadcast %cst_53 : f32 to vector<32x1xf32>
    %90 = arith.divf %89, %88 : vector<32x1xf32>
    %91 = arith.mulf %80, %90 : vector<32x1xf32>
    %cst_54 = arith.constant 1.000000e+00 : f32
    %92 = vector.broadcast %cst_54 : f32 to vector<32x1xf32>
    %93 = arith.addf %92, %91 : vector<32x1xf32>
    %94 = math.log %93 : vector<32x1xf32>
    %cst_55 = arith.constant 1.500000e+01 : f32
    %95 = vector.broadcast %cst_55 : f32 to vector<32x1xf32>
    %96 = arith.mulf %95, %94 : vector<32x1xf32>
    %97 = arith.addf %73, %96 : vector<32x1xf32>
    %98 = arith.mulf %78, %90 : vector<32x1xf32>
    %99 = arith.mulf %91, %98 : vector<32x1xf32>
    %cst_56 = arith.constant 1.000000e+00 : f32
    %100 = vector.broadcast %cst_56 : f32 to vector<32x1xf32>
    %101 = arith.addf %100, %99 : vector<32x1xf32>
    %102 = math.log %101 : vector<32x1xf32>
    %103 = arith.addf %97, %102 : vector<32x1xf32>
    %104 = vector.broadcast %91 : vector<32x1xf32> to vector<32x16xf32>
    %105 = arith.mulf %104, %83 : vector<32x16xf32>
    %106 = arith.addf %76, %105 : vector<32x16xf32>
    %c2 = arith.constant 2 : index
    %c0_57 = arith.constant 0 : index
    %c0_58 = arith.constant 0 : index
    %107 = vector.load %arg11[%c2, %c0_57, %c0_58] : memref<8x32x1xf32, #tpu.memory_space<vmem>>, vector<1x32x1xf32>
    %108 = vector.shape_cast %107 : vector<1x32x1xf32> to vector<32x1xf32>
    %c2_59 = arith.constant 2 : index
    %c0_60 = arith.constant 0 : index
    %c0_61 = arith.constant 0 : index
    %109 = vector.load %arg12[%c2_59, %c0_60, %c0_61] : memref<8x32x1xf32, #tpu.memory_space<vmem>>, vector<1x32x1xf32>
    %110 = vector.shape_cast %109 : vector<1x32x1xf32> to vector<32x1xf32>
    %c2_62 = arith.constant 2 : index
    %c0_63 = arith.constant 0 : index
    %c0_64 = arith.constant 0 : index
    %111 = vector.load %arg10[%c2_62, %c0_63, %c0_64] : memref<8x32x16xf32, #tpu.memory_space<vmem>>, vector<1x32x16xf32>
    %112 = vector.shape_cast %111 : vector<1x32x16xf32> to vector<32x16xf32>
    %113 = arith.subf %106, %112 : vector<32x16xf32>
    %114 = arith.mulf %113, %113 : vector<32x16xf32>
    %cst_65 = arith.constant dense<0.000000e+00> : vector<32xf32>
    %115 = vector.multi_reduction <add>, %114, %cst_65 [1] : vector<32x16xf32> to vector<32xf32>
    %116 = vector.shape_cast %115 : vector<32xf32> to vector<32x1xf32>
    %117 = math.sqrt %116 : vector<32x1xf32>
    %118 = arith.addf %108, %117 : vector<32x1xf32>
    %cst_66 = arith.constant 1.000000e+00 : f32
    %119 = vector.broadcast %cst_66 : f32 to vector<32x1xf32>
    %120 = arith.divf %119, %118 : vector<32x1xf32>
    %121 = arith.mulf %110, %120 : vector<32x1xf32>
    %cst_67 = arith.constant 1.000000e+00 : f32
    %122 = vector.broadcast %cst_67 : f32 to vector<32x1xf32>
    %123 = arith.addf %122, %121 : vector<32x1xf32>
    %124 = math.log %123 : vector<32x1xf32>
    %cst_68 = arith.constant 1.500000e+01 : f32
    %125 = vector.broadcast %cst_68 : f32 to vector<32x1xf32>
    %126 = arith.mulf %125, %124 : vector<32x1xf32>
    %127 = arith.addf %103, %126 : vector<32x1xf32>
    %128 = arith.mulf %108, %120 : vector<32x1xf32>
    %129 = arith.mulf %121, %128 : vector<32x1xf32>
    %cst_69 = arith.constant 1.000000e+00 : f32
    %130 = vector.broadcast %cst_69 : f32 to vector<32x1xf32>
    %131 = arith.addf %130, %129 : vector<32x1xf32>
    %132 = math.log %131 : vector<32x1xf32>
    %133 = arith.addf %127, %132 : vector<32x1xf32>
    %134 = vector.broadcast %121 : vector<32x1xf32> to vector<32x16xf32>
    %135 = arith.mulf %134, %113 : vector<32x16xf32>
    %136 = arith.addf %106, %135 : vector<32x16xf32>
    %c3 = arith.constant 3 : index
    %c0_70 = arith.constant 0 : index
    %c0_71 = arith.constant 0 : index
    %137 = vector.load %arg11[%c3, %c0_70, %c0_71] : memref<8x32x1xf32, #tpu.memory_space<vmem>>, vector<1x32x1xf32>
    %138 = vector.shape_cast %137 : vector<1x32x1xf32> to vector<32x1xf32>
    %c3_72 = arith.constant 3 : index
    %c0_73 = arith.constant 0 : index
    %c0_74 = arith.constant 0 : index
    %139 = vector.load %arg12[%c3_72, %c0_73, %c0_74] : memref<8x32x1xf32, #tpu.memory_space<vmem>>, vector<1x32x1xf32>
    %140 = vector.shape_cast %139 : vector<1x32x1xf32> to vector<32x1xf32>
    %c3_75 = arith.constant 3 : index
    %c0_76 = arith.constant 0 : index
    %c0_77 = arith.constant 0 : index
    %141 = vector.load %arg10[%c3_75, %c0_76, %c0_77] : memref<8x32x16xf32, #tpu.memory_space<vmem>>, vector<1x32x16xf32>
    %142 = vector.shape_cast %141 : vector<1x32x16xf32> to vector<32x16xf32>
    %143 = arith.subf %136, %142 : vector<32x16xf32>
    %144 = arith.mulf %143, %143 : vector<32x16xf32>
    %cst_78 = arith.constant dense<0.000000e+00> : vector<32xf32>
    %145 = vector.multi_reduction <add>, %144, %cst_78 [1] : vector<32x16xf32> to vector<32xf32>
    %146 = vector.shape_cast %145 : vector<32xf32> to vector<32x1xf32>
    %147 = math.sqrt %146 : vector<32x1xf32>
    %148 = arith.addf %138, %147 : vector<32x1xf32>
    %cst_79 = arith.constant 1.000000e+00 : f32
    %149 = vector.broadcast %cst_79 : f32 to vector<32x1xf32>
    %150 = arith.divf %149, %148 : vector<32x1xf32>
    %151 = arith.mulf %140, %150 : vector<32x1xf32>
    %cst_80 = arith.constant 1.000000e+00 : f32
    %152 = vector.broadcast %cst_80 : f32 to vector<32x1xf32>
    %153 = arith.addf %152, %151 : vector<32x1xf32>
    %154 = math.log %153 : vector<32x1xf32>
    %cst_81 = arith.constant 1.500000e+01 : f32
    %155 = vector.broadcast %cst_81 : f32 to vector<32x1xf32>
    %156 = arith.mulf %155, %154 : vector<32x1xf32>
    %157 = arith.addf %133, %156 : vector<32x1xf32>
    %158 = arith.mulf %138, %150 : vector<32x1xf32>
    %159 = arith.mulf %151, %158 : vector<32x1xf32>
    %cst_82 = arith.constant 1.000000e+00 : f32
    %160 = vector.broadcast %cst_82 : f32 to vector<32x1xf32>
    %161 = arith.addf %160, %159 : vector<32x1xf32>
    %162 = math.log %161 : vector<32x1xf32>
    %163 = arith.addf %157, %162 : vector<32x1xf32>
    %164 = vector.broadcast %151 : vector<32x1xf32> to vector<32x16xf32>
    %165 = arith.mulf %164, %143 : vector<32x16xf32>
    %166 = arith.addf %136, %165 : vector<32x16xf32>
    %c4 = arith.constant 4 : index
    %c0_83 = arith.constant 0 : index
    %c0_84 = arith.constant 0 : index
    %167 = vector.load %arg11[%c4, %c0_83, %c0_84] : memref<8x32x1xf32, #tpu.memory_space<vmem>>, vector<1x32x1xf32>
    %168 = vector.shape_cast %167 : vector<1x32x1xf32> to vector<32x1xf32>
    %c4_85 = arith.constant 4 : index
    %c0_86 = arith.constant 0 : index
    %c0_87 = arith.constant 0 : index
    %169 = vector.load %arg12[%c4_85, %c0_86, %c0_87] : memref<8x32x1xf32, #tpu.memory_space<vmem>>, vector<1x32x1xf32>
    %170 = vector.shape_cast %169 : vector<1x32x1xf32> to vector<32x1xf32>
    %c4_88 = arith.constant 4 : index
    %c0_89 = arith.constant 0 : index
    %c0_90 = arith.constant 0 : index
    %171 = vector.load %arg10[%c4_88, %c0_89, %c0_90] : memref<8x32x16xf32, #tpu.memory_space<vmem>>, vector<1x32x16xf32>
    %172 = vector.shape_cast %171 : vector<1x32x16xf32> to vector<32x16xf32>
    %173 = arith.subf %166, %172 : vector<32x16xf32>
    %174 = arith.mulf %173, %173 : vector<32x16xf32>
    %cst_91 = arith.constant dense<0.000000e+00> : vector<32xf32>
    %175 = vector.multi_reduction <add>, %174, %cst_91 [1] : vector<32x16xf32> to vector<32xf32>
    %176 = vector.shape_cast %175 : vector<32xf32> to vector<32x1xf32>
    %177 = math.sqrt %176 : vector<32x1xf32>
    %178 = arith.addf %168, %177 : vector<32x1xf32>
    %cst_92 = arith.constant 1.000000e+00 : f32
    %179 = vector.broadcast %cst_92 : f32 to vector<32x1xf32>
    %180 = arith.divf %179, %178 : vector<32x1xf32>
    %181 = arith.mulf %170, %180 : vector<32x1xf32>
    %cst_93 = arith.constant 1.000000e+00 : f32
    %182 = vector.broadcast %cst_93 : f32 to vector<32x1xf32>
    %183 = arith.addf %182, %181 : vector<32x1xf32>
    %184 = math.log %183 : vector<32x1xf32>
    %cst_94 = arith.constant 1.500000e+01 : f32
    %185 = vector.broadcast %cst_94 : f32 to vector<32x1xf32>
    %186 = arith.mulf %185, %184 : vector<32x1xf32>
    %187 = arith.addf %163, %186 : vector<32x1xf32>
    %188 = arith.mulf %168, %180 : vector<32x1xf32>
    %189 = arith.mulf %181, %188 : vector<32x1xf32>
    %cst_95 = arith.constant 1.000000e+00 : f32
    %190 = vector.broadcast %cst_95 : f32 to vector<32x1xf32>
    %191 = arith.addf %190, %189 : vector<32x1xf32>
    %192 = math.log %191 : vector<32x1xf32>
    %193 = arith.addf %187, %192 : vector<32x1xf32>
    %194 = vector.broadcast %181 : vector<32x1xf32> to vector<32x16xf32>
    %195 = arith.mulf %194, %173 : vector<32x16xf32>
    %196 = arith.addf %166, %195 : vector<32x16xf32>
    %c5 = arith.constant 5 : index
    %c0_96 = arith.constant 0 : index
    %c0_97 = arith.constant 0 : index
    %197 = vector.load %arg11[%c5, %c0_96, %c0_97] : memref<8x32x1xf32, #tpu.memory_space<vmem>>, vector<1x32x1xf32>
    %198 = vector.shape_cast %197 : vector<1x32x1xf32> to vector<32x1xf32>
    %c5_98 = arith.constant 5 : index
    %c0_99 = arith.constant 0 : index
    %c0_100 = arith.constant 0 : index
    %199 = vector.load %arg12[%c5_98, %c0_99, %c0_100] : memref<8x32x1xf32, #tpu.memory_space<vmem>>, vector<1x32x1xf32>
    %200 = vector.shape_cast %199 : vector<1x32x1xf32> to vector<32x1xf32>
    %c5_101 = arith.constant 5 : index
    %c0_102 = arith.constant 0 : index
    %c0_103 = arith.constant 0 : index
    %201 = vector.load %arg10[%c5_101, %c0_102, %c0_103] : memref<8x32x16xf32, #tpu.memory_space<vmem>>, vector<1x32x16xf32>
    %202 = vector.shape_cast %201 : vector<1x32x16xf32> to vector<32x16xf32>
    %203 = arith.subf %196, %202 : vector<32x16xf32>
    %204 = arith.mulf %203, %203 : vector<32x16xf32>
    %cst_104 = arith.constant dense<0.000000e+00> : vector<32xf32>
    %205 = vector.multi_reduction <add>, %204, %cst_104 [1] : vector<32x16xf32> to vector<32xf32>
    %206 = vector.shape_cast %205 : vector<32xf32> to vector<32x1xf32>
    %207 = math.sqrt %206 : vector<32x1xf32>
    %208 = arith.addf %198, %207 : vector<32x1xf32>
    %cst_105 = arith.constant 1.000000e+00 : f32
    %209 = vector.broadcast %cst_105 : f32 to vector<32x1xf32>
    %210 = arith.divf %209, %208 : vector<32x1xf32>
    %211 = arith.mulf %200, %210 : vector<32x1xf32>
    %cst_106 = arith.constant 1.000000e+00 : f32
    %212 = vector.broadcast %cst_106 : f32 to vector<32x1xf32>
    %213 = arith.addf %212, %211 : vector<32x1xf32>
    %214 = math.log %213 : vector<32x1xf32>
    %cst_107 = arith.constant 1.500000e+01 : f32
    %215 = vector.broadcast %cst_107 : f32 to vector<32x1xf32>
    %216 = arith.mulf %215, %214 : vector<32x1xf32>
    %217 = arith.addf %193, %216 : vector<32x1xf32>
    %218 = arith.mulf %198, %210 : vector<32x1xf32>
    %219 = arith.mulf %211, %218 : vector<32x1xf32>
    %cst_108 = arith.constant 1.000000e+00 : f32
    %220 = vector.broadcast %cst_108 : f32 to vector<32x1xf32>
    %221 = arith.addf %220, %219 : vector<32x1xf32>
    %222 = math.log %221 : vector<32x1xf32>
    %223 = arith.addf %217, %222 : vector<32x1xf32>
    %224 = vector.broadcast %211 : vector<32x1xf32> to vector<32x16xf32>
    %225 = arith.mulf %224, %203 : vector<32x16xf32>
    %226 = arith.addf %196, %225 : vector<32x16xf32>
    %c6 = arith.constant 6 : index
    %c0_109 = arith.constant 0 : index
    %c0_110 = arith.constant 0 : index
    %227 = vector.load %arg11[%c6, %c0_109, %c0_110] : memref<8x32x1xf32, #tpu.memory_space<vmem>>, vector<1x32x1xf32>
    %228 = vector.shape_cast %227 : vector<1x32x1xf32> to vector<32x1xf32>
    %c6_111 = arith.constant 6 : index
    %c0_112 = arith.constant 0 : index
    %c0_113 = arith.constant 0 : index
    %229 = vector.load %arg12[%c6_111, %c0_112, %c0_113] : memref<8x32x1xf32, #tpu.memory_space<vmem>>, vector<1x32x1xf32>
    %230 = vector.shape_cast %229 : vector<1x32x1xf32> to vector<32x1xf32>
    %c6_114 = arith.constant 6 : index
    %c0_115 = arith.constant 0 : index
    %c0_116 = arith.constant 0 : index
    %231 = vector.load %arg10[%c6_114, %c0_115, %c0_116] : memref<8x32x16xf32, #tpu.memory_space<vmem>>, vector<1x32x16xf32>
    %232 = vector.shape_cast %231 : vector<1x32x16xf32> to vector<32x16xf32>
    %233 = arith.subf %226, %232 : vector<32x16xf32>
    %234 = arith.mulf %233, %233 : vector<32x16xf32>
    %cst_117 = arith.constant dense<0.000000e+00> : vector<32xf32>
    %235 = vector.multi_reduction <add>, %234, %cst_117 [1] : vector<32x16xf32> to vector<32xf32>
    %236 = vector.shape_cast %235 : vector<32xf32> to vector<32x1xf32>
    %237 = math.sqrt %236 : vector<32x1xf32>
    %238 = arith.addf %228, %237 : vector<32x1xf32>
    %cst_118 = arith.constant 1.000000e+00 : f32
    %239 = vector.broadcast %cst_118 : f32 to vector<32x1xf32>
    %240 = arith.divf %239, %238 : vector<32x1xf32>
    %241 = arith.mulf %230, %240 : vector<32x1xf32>
    %cst_119 = arith.constant 1.000000e+00 : f32
    %242 = vector.broadcast %cst_119 : f32 to vector<32x1xf32>
    %243 = arith.addf %242, %241 : vector<32x1xf32>
    %244 = math.log %243 : vector<32x1xf32>
    %cst_120 = arith.constant 1.500000e+01 : f32
    %245 = vector.broadcast %cst_120 : f32 to vector<32x1xf32>
    %246 = arith.mulf %245, %244 : vector<32x1xf32>
    %247 = arith.addf %223, %246 : vector<32x1xf32>
    %248 = arith.mulf %228, %240 : vector<32x1xf32>
    %249 = arith.mulf %241, %248 : vector<32x1xf32>
    %cst_121 = arith.constant 1.000000e+00 : f32
    %250 = vector.broadcast %cst_121 : f32 to vector<32x1xf32>
    %251 = arith.addf %250, %249 : vector<32x1xf32>
    %252 = math.log %251 : vector<32x1xf32>
    %253 = arith.addf %247, %252 : vector<32x1xf32>
    %254 = vector.broadcast %241 : vector<32x1xf32> to vector<32x16xf32>
    %255 = arith.mulf %254, %233 : vector<32x16xf32>
    %256 = arith.addf %226, %255 : vector<32x16xf32>
    %c7 = arith.constant 7 : index
    %c0_122 = arith.constant 0 : index
    %c0_123 = arith.constant 0 : index
    %257 = vector.load %arg11[%c7, %c0_122, %c0_123] : memref<8x32x1xf32, #tpu.memory_space<vmem>>, vector<1x32x1xf32>
    %258 = vector.shape_cast %257 : vector<1x32x1xf32> to vector<32x1xf32>
    %c7_124 = arith.constant 7 : index
    %c0_125 = arith.constant 0 : index
    %c0_126 = arith.constant 0 : index
    %259 = vector.load %arg12[%c7_124, %c0_125, %c0_126] : memref<8x32x1xf32, #tpu.memory_space<vmem>>, vector<1x32x1xf32>
    %260 = vector.shape_cast %259 : vector<1x32x1xf32> to vector<32x1xf32>
    %c7_127 = arith.constant 7 : index
    %c0_128 = arith.constant 0 : index
    %c0_129 = arith.constant 0 : index
    %261 = vector.load %arg10[%c7_127, %c0_128, %c0_129] : memref<8x32x16xf32, #tpu.memory_space<vmem>>, vector<1x32x16xf32>
    %262 = vector.shape_cast %261 : vector<1x32x16xf32> to vector<32x16xf32>
    %263 = arith.subf %256, %262 : vector<32x16xf32>
    %264 = arith.mulf %263, %263 : vector<32x16xf32>
    %cst_130 = arith.constant dense<0.000000e+00> : vector<32xf32>
    %265 = vector.multi_reduction <add>, %264, %cst_130 [1] : vector<32x16xf32> to vector<32xf32>
    %266 = vector.shape_cast %265 : vector<32xf32> to vector<32x1xf32>
    %267 = math.sqrt %266 : vector<32x1xf32>
    %268 = arith.addf %258, %267 : vector<32x1xf32>
    %cst_131 = arith.constant 1.000000e+00 : f32
    %269 = vector.broadcast %cst_131 : f32 to vector<32x1xf32>
    %270 = arith.divf %269, %268 : vector<32x1xf32>
    %271 = arith.mulf %260, %270 : vector<32x1xf32>
    %cst_132 = arith.constant 1.000000e+00 : f32
    %272 = vector.broadcast %cst_132 : f32 to vector<32x1xf32>
    %273 = arith.addf %272, %271 : vector<32x1xf32>
    %274 = math.log %273 : vector<32x1xf32>
    %cst_133 = arith.constant 1.500000e+01 : f32
    %275 = vector.broadcast %cst_133 : f32 to vector<32x1xf32>
    %276 = arith.mulf %275, %274 : vector<32x1xf32>
    %277 = arith.addf %253, %276 : vector<32x1xf32>
    %278 = arith.mulf %258, %270 : vector<32x1xf32>
    %279 = arith.mulf %271, %278 : vector<32x1xf32>
    %cst_134 = arith.constant 1.000000e+00 : f32
    %280 = vector.broadcast %cst_134 : f32 to vector<32x1xf32>
    %281 = arith.addf %280, %279 : vector<32x1xf32>
    %282 = math.log %281 : vector<32x1xf32>
    %283 = arith.addf %277, %282 : vector<32x1xf32>
    %284 = vector.broadcast %271 : vector<32x1xf32> to vector<32x16xf32>
    %285 = arith.mulf %284, %263 : vector<32x16xf32>
    %286 = arith.addf %256, %285 : vector<32x16xf32>
    %287 = arith.mulf %286, %286 : vector<32x16xf32>
    %cst_135 = arith.constant dense<0.000000e+00> : vector<32xf32>
    %288 = vector.multi_reduction <add>, %287, %cst_135 [1] : vector<32x16xf32> to vector<32xf32>
    %289 = vector.shape_cast %288 : vector<32xf32> to vector<32x1xf32>
    %cst_136 = arith.constant 5.000000e-01 : f32
    %290 = vector.broadcast %cst_136 : f32 to vector<32x1xf32>
    %291 = arith.mulf %290, %289 : vector<32x1xf32>
    %cst_137 = arith.constant -14.7030163 : f32
    %292 = vector.broadcast %cst_137 : f32 to vector<32x1xf32>
    %293 = arith.subf %292, %291 : vector<32x1xf32>
    %294 = arith.addf %293, %283 : vector<32x1xf32>
    %295 = math.exp %294 : vector<32x1xf32>
    %c0_138 = arith.constant 0 : index
    %c0_139 = arith.constant 0 : index
    %296 = vector.load %arg13[%c0_138, %c0_139] : memref<32x128xf32, #tpu.memory_space<vmem>>, vector<32x128xf32>
    %297 = vector.broadcast %295 : vector<32x1xf32> to vector<32x128xf32>
    %298 = arith.mulf %296, %297 : vector<32x128xf32>
    %c0_140 = arith.constant 0 : index
    %c0_141 = arith.constant 0 : index
    %299 = vector.load %arg14[%c0_140, %c0_141] : memref<8x32xf32, #tpu.memory_space<vmem>>, vector<8x32xf32>
    %cst_142 = arith.constant dense<0.000000e+00> : vector<8x128xf32>
    %300 = tpu.matmul %299, %298, %cst_142 {dimension_numbers = #tpu.dot_dimension_numbers<[1], [0], [0], [1], [0, 0, 1, 1], [], []>} : vector<8x32xf32>, vector<32x128xf32>, vector<8x128xf32> -> vector<8x128xf32>
    %cst_143 = arith.constant 1.000000e+00 : f32
    %301 = vector.broadcast %cst_143 : f32 to vector<8x128xf32>
    %302 = arith.addf %301, %300 : vector<8x128xf32>
    %c0_144 = arith.constant 0 : index
    %c0_145 = arith.constant 0 : index
    %303 = vector.load %arg15[%c0_144, %c0_145] : memref<8x128xf32, #tpu.memory_space<vmem>>, vector<8x128xf32>
    tpu.vector_store %arg15[%c0_144, %c0_145], %302 {strides = array<i32>} : memref<8x128xf32, #tpu.memory_space<vmem>>, vector<8x128xf32>,
    return
  }
}

</mosaic_0001>

<bundles_post_ra>
// kernel: posterior_network_forward.1
= control target key start
LH: loop header
LB: loop body
LE: loop exit
PB: predicated region body
PF: predicated region fallthrough
CT: control target
= control target key end

     0   :  { %vm77_vm0 = vcmask 261120   ;;  %vm302_vm1 = vcmask 523264   ;;  %vm713_vm2 = vcmask 130048   ;;  %s3731_s1 = inlined_call_operand.vmem [shape: f32[32,64], index: 1, kind: input, shape index: {}]   ;;  %s3732_s0 = inlined_call_operand.vmem [shape: f32[128,32], index: 0, kind: input, shape index: {}]   ;;  %s3733_s3 = inlined_call_operand.vmem [shape: f32[64,64], index: 3, kind: input, shape index: {}]   ;;  %s3734_s2 = inlined_call_operand.vmem [shape: f32[1,64], index: 2, kind: input, shape index: {}]   ;;  %s3735_s7 = inlined_call_operand.vmem [shape: f32[32,128], index: 7, kind: input, shape index: {}]   ;;  %s3736_s5 = inlined_call_operand.vmem [shape: f32[64,16], index: 5, kind: input, shape index: {}]   ;;  %s3737_s4 = inlined_call_operand.vmem [shape: f32[1,64], index: 4, kind: input, shape index: {}]   ;;  %s3738_s6 = inlined_call_operand.vmem [shape: f32[1,16], index: 6, kind: input, shape index: {}]   ;;  %s3739_s8 = inlined_call_operand.vmem [shape: f32[1,16], index: 8, kind: input, shape index: {}]   ;;  %s3740_s9 = inlined_call_operand.vmem [shape: f32[1,16], index: 9, kind: input, shape index: {}]   ;;  %s3741_s10 = inlined_call_operand.vmem [shape: f32[8,32,16], index: 10, kind: input, shape index: {}]   ;;  %s3742_s11 = inlined_call_operand.vmem [shape: f32[8,32,1], index: 11, kind: input, shape index: {}]   ;;  %s3743_s12 = inlined_call_operand.vmem [shape: f32[8,32,1], index: 12, kind: input, shape index: {}]   ;;  %s3744_s13 = inlined_call_operand.vmem [shape: f32[32,128], index: 13, kind: input, shape index: {}]   ;;  %s3745_s14 = inlined_call_operand.vmem [shape: f32[8,32], index: 14, kind: input, shape index: {}]   ;;  %s3746_s15 = inlined_call_operand.vmem [shape: f32[8,128], index: 15, kind: output, shape index: {}]  }
   0x1   :  { %v69_v0 = vld [vmem:[%s3731_s1 + $0x18] sm:$0xff]  ;;  %v68_v1 = vld [vmem:[%s3731_s1 + $0x10] sm:$0xff]  ;;  %v50_v2 = vld [vmem:[%s3732_s0] sm:$0xff] }
   0x2   :  { %2334 = vmatprep.subr.mxu0 %v69_v0  ;;  %v67_v3 = vld [vmem:[%s3731_s1 + $0x8] sm:$0xff]  ;;  %2342 = vmatprep.mubr.msk.f32.mxu0 %vm77_vm0, %v50_v2  ;;  %v66_v4 = vld [vmem:[%s3731_s1] sm:$0xff]  ;;  %v294_v6 = vld [vmem:[%s3733_s3 + $0x38] sm:$0xff] }
   0x3   :  { %2335 = vmatpush3.msra.mxu0 %v69_v0  ;;  %v51_v5 = vld [vmem:[%s3732_s0 + $0x8] sm:$0xff]  ;;  %v52_v7 = vld [vmem:[%s3732_s0 + $0x10] sm:$0xff]  ;;  %2366 = vmatprep.subr.mxu1 %v294_v6  ;;  %v53_v10 = vld [vmem:[%s3732_s0 + $0x18] sm:$0xff] }
   0x4   :  { %2336 = vmatprep.subr.mxu0 %v68_v1  ;;  %v293_v8 = vld [vmem:[%s3733_s3 + $0x30] sm:$0xff]  ;;  %2367 = vmatpush3.msra.mxu1 %v294_v6  ;;  %v292_v9 = vld [vmem:[%s3733_s3 + $0x28] sm:$0xff]  ;;  %v291_v11 = vld [vmem:[%s3733_s3 + $0x20] sm:$0xff] }
   0x5   :  { %2337 = vmatpush3.msra.mxu0 %v68_v1  ;;  %2368 = vmatprep.subr.mxu1 %v293_v8  ;;  %v54_v12 = vld [vmem:[%s3732_s0 + $0x20] sm:$0xff]  ;;  %v55_v13 = vld [vmem:[%s3732_s0 + $0x28] sm:$0xff]  ;;  %v56_v14 = vld [vmem:[%s3732_s0 + $0x30] sm:$0xff] }
   0x6   :  { %2338 = vmatprep.subr.mxu0 %v67_v3  ;;  %2369 = vmatpush3.msra.mxu1 %v293_v8  ;;  %v57_v15 = vld [vmem:[%s3732_s0 + $0x38] sm:$0xff]  ;;  %v58_v16 = vld [vmem:[%s3732_s0 + $0x40] sm:$0xff]  ;;  %v59_v17 = vld [vmem:[%s3732_s0 + $0x48] sm:$0xff] }
   0x7   :  { %2339 = vmatpush3.msra.mxu0 %v67_v3  ;;  %2370 = vmatprep.subr.mxu1 %v292_v9  ;;  %v60_v18 = vld [vmem:[%s3732_s0 + $0x50] sm:$0xff]  ;;  %v61_v19 = vld [vmem:[%s3732_s0 + $0x58] sm:$0xff]  ;;  %v62_v20 = vld [vmem:[%s3732_s0 + $0x60] sm:$0xff] }
   0x8   :  { %2340 = vmatprep.subr.mxu0 %v66_v4  ;;  %2371 = vmatpush3.msra.mxu1 %v292_v9  ;;  %v63_v21 = vld [vmem:[%s3732_s0 + $0x68] sm:$0xff]  ;;  %v64_v22 = vld [vmem:[%s3732_s0 + $0x70] sm:$0xff]  ;;  %v65_v23 = vld [vmem:[%s3732_s0 + $0x78] sm:$0xff] }
   0x9   :  { %2341 = vmatpush3.msra.mxu0 %v66_v4  ;;  %2372 = vmatprep.subr.mxu1 %v291_v11  ;;  %v290_v24 = vld [vmem:[%s3733_s3 + $0x18] sm:$0xff]  ;;  %v289_v25 = vld [vmem:[%s3733_s3 + $0x10] sm:$0xff]  ;;  %v288_v26 = vld [vmem:[%s3733_s3 + $0x8] sm:$0xff] }
   0xa   :  { %2343 = vmatmul.mubr.msk.f32.vlgmr.msra.gmra.mxu0 %vm77_vm0, %v51_v5  ;;  %2373 = vmatpush3.msra.mxu1 %v291_v11  ;;  %v287_v27 = vld [vmem:[%s3733_s3] sm:$0xff] }
   0xb   :  { %2345 = vmatprep.mubr.msk.f32.mxu0 %vm77_vm0, %v52_v7  ;;  %2374 = vmatprep.subr.mxu1 %v290_v24  ;;  %v2127_v28 = vld [vmem:[%s3734_s2] ss:$0 sm:$0xff] }
   0xc   :  { %2375 = vmatpush3.msra.mxu1 %v290_v24 }
   0xd   :  { %2376 = vmatprep.subr.mxu1 %v289_v25 }
   0xe   :  { %2346 = vmatmul.mubr.msk.f32.gmra.mxu0 %vm77_vm0, %v53_v10  ;;  %2377 = vmatpush3.msra.mxu1 %v289_v25 }
   0xf   :  { %2348 = vmatprep.mubr.msk.f32.mxu0 %vm77_vm0, %v54_v12  ;;  %2378 = vmatprep.subr.mxu1 %v288_v26 }
  0x10   :  { %2379 = vmatpush3.msra.mxu1 %v288_v26 }
  0x11   :  { %2380 = vmatprep.subr.mxu1 %v287_v27 }
  0x12   :  { %2349 = vmatmul.mubr.msk.f32.gmra.mxu0 %vm77_vm0, %v55_v13  ;;  %2381 = vmatpush3.msra.mxu1 %v287_v27  ;;  %v512_v13 = vld [vmem:[%s3735_s7] sm:$0xff] }
  0x13   :  { %2351 = vmatprep.mubr.msk.f32.mxu0 %vm77_vm0, %v56_v14  ;;  %v608_v14 = vld [vmem:[%s3736_s5 + $0x38] sm:$0xff] }
  0x14   :  { %2444 = vmatprep.subr.mxu1 %v608_v14 }
  0x16   :  { %2352 = vmatmul.mubr.msk.f32.gmra.mxu0 %vm77_vm0, %v57_v15  ;;  %v607_v15 = vld [vmem:[%s3736_s5 + $0x30] sm:$0xff] }
  0x17   :  { %2354 = vmatprep.mubr.msk.f32.mxu0 %vm77_vm0, %v58_v16  ;;  %v606_v16 = vld [vmem:[%s3736_s5 + $0x28] sm:$0xff] }
  0x1a   :  { %2355 = vmatmul.mubr.msk.f32.gmra.mxu0 %vm77_vm0, %v59_v17  ;;  %v605_v17 = vld [vmem:[%s3736_s5 + $0x20] sm:$0xff] }
  0x1b   :  { %2357 = vmatprep.mubr.msk.f32.mxu0 %vm77_vm0, %v60_v18  ;;  %v604_v18 = vld [vmem:[%s3736_s5 + $0x18] sm:$0xff] }
  0x1e   :  { %2358 = vmatmul.mubr.msk.f32.gmra.mxu0 %vm77_vm0, %v61_v19  ;;  %v603_v19 = vld [vmem:[%s3736_s5 + $0x10] sm:$0xff] }
  0x1f   :  { %2360 = vmatprep.mubr.msk.f32.mxu0 %vm77_vm0, %v62_v20  ;;  %v602_v20 = vld [vmem:[%s3736_s5 + $0x8] sm:$0xff] }
  0x22   :  { %2361 = vmatmul.mubr.msk.f32.gmra.mxu0 %vm77_vm0, %v63_v21 }
  0x23   :  { %2363 = vmatprep.mubr.msk.f32.mxu0 %vm77_vm0, %v64_v22 }
  0x26   :  { %2364 = vmatmul.mubr.msk.f32.gmra.mxu0 %vm77_vm0, %v65_v23 }
  0x27   :  { %2438 = vmatprep.mubr.f32.mxu0 %v512_v13 }
  0xca   :  { %v2344_v29 = vpop.f32.mrf.mxu0 }
  0xcb   :  { %v198_v30 = vadd.f32 %v2344_v29, %v2127_v28 }
  0xcc   :  { %v192_v31 = vpop.f32.mrf.mxu0 }
  0xcd   :  { %v193_v32 = vadd.f32 %v2127_v28, %v192_v31  ;;  %v272_v35 = vmax.f32 %v198_v30, 0.0 }
  0xce   :  { %v2347_v33 = vpop.f32.mrf.mxu0 }
  0xcf   :  { %v271_v34 = vmax.f32 %v193_v32, 0.0  ;;  %v208_v36 = vadd.f32 %v2347_v33, %v2127_v28 }
  0xd0   :  { %v202_v37 = vpop.f32.mrf.mxu0 }
  0xd1   :  { %v203_v38 = vadd.f32 %v2127_v28, %v202_v37  ;;  %2382 = vmatprep.mubr.msk.f32.mxu1 %vm302_vm1, %v271_v34  ;;  %v274_v41 = vmax.f32 %v208_v36, 0.0 }
  0xd2   :  { %v2350_v39 = vpop.f32.mrf.mxu0  ;;  %2383 = vmatmul.mubr.msk.f32.vlgmr.msra.gmra.mxu1 %vm302_vm1, %v272_v35  ;;  %v2144_v35 = vld [vmem:[%s3737_s4] ss:$0 sm:$0xff] }
  0xd3   :  { %v273_v40 = vmax.f32 %v203_v38, 0.0  ;;  %v218_v42 = vadd.f32 %v2350_v39, %v2127_v28  ;;  %2445 = vmatpush3.msra.mxu1 %v608_v14 }
  0xd4   :  { %v212_v43 = vpop.f32.mrf.mxu0  ;;  %2446 = vmatprep.subr.mxu1 %v607_v15 }
  0xd5   :  { %v213_v44 = vadd.f32 %v2127_v28, %v212_v43  ;;  %2385 = vmatprep.mubr.msk.f32.mxu1 %vm302_vm1, %v273_v40  ;;  %v276_v47 = vmax.f32 %v218_v42, 0.0  ;;  %2447 = vmatpush3.msra.mxu1 %v607_v15  ;;  %v2161_v15 = vld [vmem:[%s3738_s6] ss:$0 sm:$0xff] }
  0xd6   :  { %v2353_v45 = vpop.f32.mrf.mxu0  ;;  %2386 = vmatmul.mubr.msk.f32.gmra.mxu1 %vm302_vm1, %v274_v41  ;;  %2448 = vmatprep.subr.mxu1 %v606_v16 }
  0xd7   :  { %v275_v46 = vmax.f32 %v213_v44, 0.0  ;;  %v228_v48 = vadd.f32 %v2353_v45, %v2127_v28  ;;  %2449 = vmatpush3.msra.mxu1 %v606_v16 }
  0xd8   :  { %v222_v49 = vpop.f32.mrf.mxu0  ;;  %2450 = vmatprep.subr.mxu1 %v605_v17 }
  0xd9   :  { %v223_v50 = vadd.f32 %v2127_v28, %v222_v49  ;;  %2388 = vmatprep.mubr.msk.f32.mxu1 %vm302_vm1, %v275_v46  ;;  %v278_v53 = vmax.f32 %v228_v48, 0.0  ;;  %2451 = vmatpush3.msra.mxu1 %v605_v17 }
  0xda   :  { %v2356_v51 = vpop.f32.mrf.mxu0  ;;  %2389 = vmatmul.mubr.msk.f32.gmra.mxu1 %vm302_vm1, %v276_v47  ;;  %2452 = vmatprep.subr.mxu1 %v604_v18 }
  0xdb   :  { %v277_v52 = vmax.f32 %v223_v50, 0.0  ;;  %v238_v54 = vadd.f32 %v2356_v51, %v2127_v28  ;;  %2453 = vmatpush3.msra.mxu1 %v604_v18 }
  0xdc   :  { %v232_v55 = vpop.f32.mrf.mxu0  ;;  %2454 = vmatprep.subr.mxu1 %v603_v19 }
  0xdd   :  { %v233_v56 = vadd.f32 %v2127_v28, %v232_v55  ;;  %2391 = vmatprep.mubr.msk.f32.mxu1 %vm302_vm1, %v277_v52  ;;  %v280_v59 = vmax.f32 %v238_v54, 0.0  ;;  %2455 = vmatpush3.msra.mxu1 %v603_v19 }
  0xde   :  { %v2359_v57 = vpop.f32.mrf.mxu0  ;;  %2392 = vmatmul.mubr.msk.f32.gmra.mxu1 %vm302_vm1, %v278_v53  ;;  %2456 = vmatprep.subr.mxu1 %v602_v20 }
  0xdf   :  { %v279_v58 = vmax.f32 %v233_v56, 0.0  ;;  %v248_v60 = vadd.f32 %v2359_v57, %v2127_v28  ;;  %2457 = vmatpush3.msra.mxu1 %v602_v20 }
  0xe0   :  { %v242_v61 = vpop.f32.mrf.mxu0 }
  0xe1   :  { %v243_v62 = vadd.f32 %v2127_v28, %v242_v61  ;;  %2394 = vmatprep.mubr.msk.f32.mxu1 %vm302_vm1, %v279_v58  ;;  %v282_v1 = vmax.f32 %v248_v60, 0.0 }
  0xe2   :  { %v2362_v63 = vpop.f32.mrf.mxu0  ;;  %2395 = vmatmul.mubr.msk.f32.gmra.mxu1 %vm302_vm1, %v280_v59 }
  0xe3   :  { %v281_v0 = vmax.f32 %v243_v62, 0.0  ;;  %v258_v2 = vadd.f32 %v2362_v63, %v2127_v28 }
  0xe4   :  { %v252_v3 = vpop.f32.mrf.mxu0 }
  0xe5   :  { %v253_v4 = vadd.f32 %v2127_v28, %v252_v3  ;;  %2397 = vmatprep.mubr.msk.f32.mxu1 %vm302_vm1, %v281_v0  ;;  %v284_v7 = vmax.f32 %v258_v2, 0.0 }
  0xe6   :  { %v2365_v5 = vpop.f32.mrf.mxu0  ;;  %2398 = vmatmul.mubr.msk.f32.gmra.mxu1 %vm302_vm1, %v282_v1 }
  0xe7   :  { %v283_v6 = vmax.f32 %v253_v4, 0.0  ;;  %v268_v8 = vadd.f32 %v2365_v5, %v2127_v28 }
  0xe8   :  { %v262_v9 = vpop.f32.mrf.mxu0 }
  0xe9   :  { %v263_v10 = vadd.f32 %v2127_v28, %v262_v9  ;;  %2400 = vmatprep.mubr.msk.f32.mxu1 %vm302_vm1, %v283_v6  ;;  %v286_v12 = vmax.f32 %v268_v8, 0.0  ;;  %v513_v6 = vld [vmem:[%s3735_s7 + $0x8] sm:$0xff]  ;;  %v515_v8 = vld [vmem:[%s3735_s7 + $0x18] sm:$0xff]  ;;  %v601_v9 = vld [vmem:[%s3736_s5] sm:$0xff] }
  0xea   :  { %2401 = vmatmul.mubr.msk.f32.gmra.mxu1 %vm302_vm1, %v284_v7  ;;  %v514_v7 = vld [vmem:[%s3735_s7 + $0x10] sm:$0xff]  ;;  %2458 = vmatprep.subr.mxu1 %v601_v9 }
  0xeb   :  { %v285_v11 = vmax.f32 %v263_v10, 0.0  ;;  %2459 = vmatpush3.msra.mxu1 %v601_v9  ;;  %v789_v9 = vld [vmem:[%s3741_s10 + $0x10] sm:$0xff] }
  0xed   :  { %2403 = vmatprep.mubr.msk.f32.mxu1 %vm302_vm1, %v285_v11 }
  0xee   :  { %2404 = vmatmul.mubr.msk.f32.gmra.mxu1 %vm302_vm1, %v286_v12 }
 0x192   :  { %v2974_v21 = vpop.f32.mrf.mxu1 }
 0x193   :  { %v423_v0 = vadd.f32 %v2974_v21, %v2144_v35 }
 0x194   :  { %v2976_v22 = vpop.f32.mrf.mxu1 }
 0x195   :  { %v418_v2 = vadd.f32 %v2144_v35, %v2976_v22  ;;  %v497_v4 = vmax.f32 %v423_v0, 0.0 }
 0x196   :  { %v2387_v23 = vpop.f32.mrf.mxu1 }
 0x197   :  { %v433_v60 = vadd.f32 %v2387_v23, %v2144_v35  ;;  %v496_v5 = vmax.f32 %v418_v2, 0.0  ;;  %v2167_v2 = vld [vmem:[%s3740_s9] ss:$0 sm:$0xff] }
 0x198   :  { %v427_v24 = vpop.f32.mrf.mxu1 }
 0x199   :  { %v428_v62 = vadd.f32 %v2144_v35, %v427_v24  ;;  %v499_v1 = vmax.f32 %v433_v60, 0.0 }
 0x19a   :  { %v2390_v25 = vpop.f32.mrf.mxu1 }
 0x19b   :  { %v443_v56 = vadd.f32 %v2390_v25, %v2144_v35  ;;  %v498_v3 = vmax.f32 %v428_v62, 0.0 }
 0x19c   :  { %v437_v26 = vpop.f32.mrf.mxu1 }
 0x19d   :  { %v438_v58 = vadd.f32 %v2144_v35, %v437_v26  ;;  %v501_v61 = vmax.f32 %v443_v56, 0.0 }
 0x19e   :  { %v2393_v27 = vpop.f32.mrf.mxu1 }
 0x19f   :  { %v453_v52 = vadd.f32 %v2393_v27, %v2144_v35  ;;  %v500_v63 = vmax.f32 %v438_v58, 0.0 }
 0x1a0   :  { %v447_v28 = vpop.f32.mrf.mxu1 }
 0x1a1   :  { %v448_v54 = vadd.f32 %v2144_v35, %v447_v28  ;;  %v503_v57 = vmax.f32 %v453_v52, 0.0 }
 0x1a2   :  { %v2396_v29 = vpop.f32.mrf.mxu1 }
 0x1a3   :  { %v463_v48 = vadd.f32 %v2396_v29, %v2144_v35  ;;  %v502_v59 = vmax.f32 %v448_v54, 0.0 }
 0x1a4   :  { %v457_v30 = vpop.f32.mrf.mxu1 }
 0x1a5   :  { %v458_v50 = vadd.f32 %v2144_v35, %v457_v30  ;;  %v505_v53 = vmax.f32 %v463_v48, 0.0 }
 0x1a6   :  { %v2399_v31 = vpop.f32.mrf.mxu1 }
 0x1a7   :  { %v473_v44 = vadd.f32 %v2399_v31, %v2144_v35  ;;  %v504_v55 = vmax.f32 %v458_v50, 0.0 }
 0x1a8   :  { %v467_v32 = vpop.f32.mrf.mxu1 }
 0x1a9   :  { %v468_v46 = vadd.f32 %v2144_v35, %v467_v32  ;;  %v507_v49 = vmax.f32 %v473_v44, 0.0 }
 0x1aa   :  { %v2402_v33 = vpop.f32.mrf.mxu1 }
 0x1ab   :  { %v483_v39 = vadd.f32 %v2402_v33, %v2144_v35  ;;  %v506_v51 = vmax.f32 %v468_v46, 0.0 }
 0x1ac   :  { %v477_v34 = vpop.f32.mrf.mxu1 }
 0x1ad   :  { %v478_v42 = vadd.f32 %v2144_v35, %v477_v34  ;;  %v509_v45 = vmax.f32 %v483_v39, 0.0 }
 0x1ae   :  { %v2405_v36 = vpop.f32.mrf.mxu1 }
 0x1af   :  { %v493_v37 = vadd.f32 %v2405_v36, %v2144_v35  ;;  %v508_v47 = vmax.f32 %v478_v42, 0.0 }
 0x1b0   :  { %v487_v38 = vpop.f32.mrf.mxu1 }
 0x1b1   :  { %v511_v40 = vmax.f32 %v493_v37, 0.0  ;;  %v488_v41 = vadd.f32 %v2144_v35, %v487_v38 }
 0x1b3   :  { %v510_v43 = vmax.f32 %v488_v41, 0.0  ;;  %2406 = vmatprep.subr.mxu0 %v511_v40 }
 0x1b4   :  { %2407 = vmatpush3.msra.mxu0 %v511_v40 }
 0x1b5   :  { %2408 = vmatprep.subr.mxu0 %v510_v43 }
 0x1b6   :  { %2409 = vmatpush3.msra.mxu0 %v510_v43 }
 0x1b7   :  { %2410 = vmatprep.subr.mxu0 %v509_v45 }
 0x1b8   :  { %2411 = vmatpush3.msra.mxu0 %v509_v45 }
 0x1b9   :  { %2412 = vmatprep.subr.mxu0 %v508_v47 }
 0x1ba   :  { %2413 = vmatpush3.msra.mxu0 %v508_v47 }
 0x1bb   :  { %2414 = vmatprep.subr.mxu0 %v507_v49 }
 0x1bc   :  { %2415 = vmatpush3.msra.mxu0 %v507_v49 }
 0x1bd   :  { %2416 = vmatprep.subr.mxu0 %v506_v51 }
 0x1be   :  { %2417 = vmatpush3.msra.mxu0 %v506_v51 }
 0x1bf   :  { %2418 = vmatprep.subr.mxu0 %v505_v53 }
 0x1c0   :  { %2419 = vmatpush3.msra.mxu0 %v505_v53 }
 0x1c1   :  { %2420 = vmatprep.subr.mxu0 %v504_v55 }
 0x1c2   :  { %2421 = vmatpush3.msra.mxu0 %v504_v55 }
 0x1c3   :  { %2422 = vmatprep.subr.mxu0 %v503_v57 }
 0x1c4   :  { %2423 = vmatpush3.msra.mxu0 %v503_v57 }
 0x1c5   :  { %2424 = vmatprep.subr.mxu0 %v502_v59 }
 0x1c6   :  { %2425 = vmatpush3.msra.mxu0 %v502_v59 }
 0x1c7   :  { %2426 = vmatprep.subr.mxu0 %v501_v61 }
 0x1c8   :  { %2427 = vmatpush3.msra.mxu0 %v501_v61  ;;  %v2166_v61 = vld [vmem:[%s3739_s8] ss:$0 sm:$0xff] }
 0x1c9   :  { %2428 = vmatprep.subr.mxu0 %v500_v63 }
 0x1ca   :  { %2429 = vmatpush3.msra.mxu0 %v500_v63 }
 0x1cb   :  { %2430 = vmatprep.subr.mxu0 %v499_v1 }
 0x1cc   :  { %2431 = vmatpush3.msra.mxu0 %v499_v1 }
 0x1cd   :  { %2432 = vmatprep.subr.mxu0 %v498_v3 }
 0x1ce   :  { %2433 = vmatpush3.msra.mxu0 %v498_v3 }
 0x1cf   :  { %2434 = vmatprep.subr.mxu0 %v497_v4 }
 0x1d0   :  { %2435 = vmatpush3.msra.mxu0 %v497_v4 }
 0x1d1   :  { %2436 = vmatprep.subr.mxu0 %v496_v5 }
 0x1d2   :  { %2437 = vmatpush3.msra.mxu0 %v496_v5  ;;  %v790_v5 = vld [vmem:[%s3741_s10 + $0x18] sm:$0xff] }
 0x1d3   :  { %2439 = vmatmul.mubr.f32.vlgmr.msra.gmra.mxu0 %v513_v6 }
 0x1d4   :  { %2441 = vmatprep.mubr.f32.mxu0 %v514_v7 }
 0x1d7   :  { %2442 = vmatmul.mubr.f32.gmra.mxu0 %v515_v8  ;;  %v788_v8 = vld [vmem:[%s3741_s10 + $0x8] sm:$0xff] }
 0x293   :  { %v2440_v10 = vpop.f32.mrf.mxu0 }
 0x295   :  { %v582_v11 = vpop.f32.mrf.mxu0 }
 0x296   :  { %2460 = vmatprep.mubr.msk.f32.mxu1 %vm302_vm1, %v582_v11 }
 0x297   :  { %v2443_v12 = vpop.f32.mrf.mxu0  ;;  %2461 = vmatmul.mubr.msk.f32.vlgmr.msra.gmra.mxu1 %vm302_vm1, %v2440_v10  ;;  %v787_v10 = vld [vmem:[%s3741_s10] sm:$0xff] }
 0x299   :  { %v592_v13 = vpop.f32.mrf.mxu0 }
 0x29a   :  { %2463 = vmatprep.mubr.msk.f32.mxu1 %vm302_vm1, %v592_v13 }
 0x29b   :  { %2464 = vmatmul.mubr.msk.f32.gmra.mxu1 %vm302_vm1, %v2443_v12 }
 0x357   :  { %v2462_v14 = vpop.f32.mrf.mxu1 }
 0x358   :  { %v700_v17 = vadd.f32 %v2462_v14, %v2161_v15 }
 0x359   :  { %v694_v16 = vpop.f32.mrf.mxu1 }
 0x35a   :  { %v695_v18 = vadd.f32 %v2161_v15, %v694_v16  ;;  %v715_v22 = vsel %vm713_vm2, %v700_v17, 0.0 }
 0x35b   :  { %v2465_v19 = vpop.f32.mrf.mxu1 }
 0x35c   :  { %v714_v20 = vsel %vm713_vm2, %v695_v18, 0.0  ;;  %v710_v23 = vadd.f32 %v2465_v19, %v2161_v15 }
 0x35d   :  { %v704_v21 = vpop.f32.mrf.mxu1  ;;  %v716_v25 = vadd.f32 %v715_v22, %v714_v20 }
 0x35e   :  { %v705_v24 = vadd.f32 %v2161_v15, %v704_v21  ;;  %v719_v28 = vsel %vm713_vm2, %v710_v23, 0.0 }
 0x360   :  { %v717_v26 = vsel %vm713_vm2, %v705_v24, 0.0 }
 0x361   :  { %v718_v27 = vadd.f32 %v717_v26, %v716_v25 }
 0x363   :  { %v720_v29 = vadd.f32 %v719_v28, %v718_v27  ;;  %v2748_v27 = vmov 0  }
 0x364   :  { %2480 = vset.pattern.permute.xlu0 %v2748_v27  ;;  %2481 = vset.pattern.permute.xlu1 %v2748_v27 }
 0x365   :  { %v721_v30 = vrot.slane %v720_v29, 4 }
 0x367   :  { %v722_v31 = vadd.f32 %v721_v30, %v720_v29 }
 0x369   :  { %v723_v32 = vrot.slane %v722_v31, 2 }
 0x36b   :  { %v724_v33 = vadd.f32 %v723_v32, %v722_v31 }
 0x36d   :  { %v725_v34 = vrot.slane %v724_v33, 1 }
 0x36f   :  { %v726_v35 = vadd.f32 %v725_v34, %v724_v33 }
 0x371   :  { %v728_v36 = vmul.f32 0.03125, %v726_v35 }
 0x373   :  { %v729_v37 = vsub.f32 %v695_v18, %v728_v36  ;;  %v730_v38 = vsub.f32 %v700_v17, %v728_v36  ;;  %v731_v39 = vsub.f32 %v705_v24, %v728_v36  ;;  %v732_v40 = vsub.f32 %v710_v23, %v728_v36 }
 0x375   :  { %v733_v41 = vmul.f32 %v729_v37, %v729_v37  ;;  %v734_v42 = vmul.f32 %v730_v38, %v730_v38  ;;  %v735_v43 = vmul.f32 %v731_v39, %v731_v39  ;;  %v736_v44 = vmul.f32 %v732_v40, %v732_v40 }
 0x377   :  { %v737_v45 = vsel %vm713_vm2, %v733_v41, 0.0  ;;  %v738_v46 = vsel %vm713_vm2, %v734_v42, 0.0  ;;  %v740_v48 = vsel %vm713_vm2, %v735_v43, 0.0  ;;  %v742_v50 = vsel %vm713_vm2, %v736_v44, 0.0 }
 0x378   :  { %v739_v47 = vadd.f32 %v738_v46, %v737_v45 }
 0x37a   :  { %v741_v49 = vadd.f32 %v740_v48, %v739_v47 }
 0x37c   :  { %v743_v51 = vadd.f32 %v742_v50, %v741_v49  ;;  %v781_v50 = vld [vmem:[%s3742_s11 + $0x10] sm:$0xff] }
 0x37e   :  { %v744_v52 = vrot.slane %v743_v51, 4 }
 0x380   :  { %v745_v53 = vadd.f32 %v744_v52, %v743_v51 }
 0x382   :  { %v746_v54 = vrot.slane %v745_v53, 2 }
 0x384   :  { %v747_v55 = vadd.f32 %v746_v54, %v745_v53  ;;  %v779_v54 = vld [vmem:[%s3742_s11] sm:$0xff] }
 0x386   :  { %v748_v56 = vrot.slane %v747_v55, 1 }
 0x388   :  { %v749_v57 = vadd.f32 %v748_v56, %v747_v55 }
 0x38a   :  { %v750_v58 = vmul.f32 0.03125, %v749_v57 }
 0x38c   :  { %v751_v59 = vadd.f32 1e-05, %v750_v58 }
 0x38e   :  { %2482 = vrsqrt.f32 %v751_v59 }
 0x39b   :  { %v2483_v60 = vpop.eup %2482 }
 0x39c   :  { %v755_v62 = vmul.f32 %v2483_v60, %v731_v39  ;;  %v756_v63 = vmul.f32 %v2483_v60, %v732_v40  ;;  %v754_v0 = vmul.f32 %v2483_v60, %v730_v38  ;;  %v753_v1 = vmul.f32 %v2483_v60, %v729_v37  ;;  %v782_v37 = vld [vmem:[%s3742_s11 + $0x18] sm:$0xff]  ;;  %v780_v40 = vld [vmem:[%s3742_s11 + $0x8] sm:$0xff] }
 0x39d   :  { %v786_v60 = vld [vmem:[%s3743_s12 + $0x18] sm:$0xff] }
 0x39e   :  { %v766_v3 = vmul.f32 %v2166_v61, %v755_v62  ;;  %v767_v4 = vmul.f32 %v2166_v61, %v756_v63  ;;  %v765_v6 = vmul.f32 %v2166_v61, %v754_v0  ;;  %v764_v7 = vmul.f32 %v2166_v61, %v753_v1  ;;  %v784_v61 = vld [vmem:[%s3743_s12 + $0x8] sm:$0xff] }
 0x3a0   :  { %v3028_v11 = vadd.f32 %v2167_v2, %v767_v4  ;;  %v3030_v12 = vadd.f32 %v2167_v2, %v765_v6  ;;  %v3032_v13 = vadd.f32 %v2167_v2, %v766_v3  ;;  %v3034_v14 = vadd.f32 %v2167_v2, %v764_v7  ;;  %v785_v2 = vld [vmem:[%s3743_s12 + $0x10] sm:$0xff]  ;;  %v783_v7 = vld [vmem:[%s3743_s12] sm:$0xff] }
 0x3a2   :  { %v3037_v15 = vsub.f32 %v3028_v11, %v790_v5  ;;  %v3040_v16 = vsub.f32 %v3030_v12, %v788_v8  ;;  %v3043_v17 = vsub.f32 %v3032_v13, %v789_v9  ;;  %v3046_v18 = vsub.f32 %v3034_v14, %v787_v10 }
 0x3a4   :  { %v798_v19 = vmul.f32 %v3037_v15, %v3037_v15  ;;  %v796_v20 = vmul.f32 %v3040_v16, %v3040_v16  ;;  %v797_v23 = vmul.f32 %v3043_v17, %v3043_v17  ;;  %v795_v24 = vmul.f32 %v3046_v18, %v3046_v18 }
 0x3a6   :  { %v808_v21 = vsel %vm713_vm2, %v798_v19, 0.0  ;;  %v802_v22 = vsel %vm713_vm2, %v796_v20, 0.0  ;;  %v805_v25 = vsel %vm713_vm2, %v797_v23, 0.0  ;;  %v799_v26 = vsel %vm713_vm2, %v795_v24, 0.0 }
 0x3a7   :  { %809 = vadd.xlane.f32.xlu0 %v808_v21  ;;  %803 = vadd.xlane.f32.xlu1 %v802_v22 }
 0x3ab   :  { %806 = vadd.xlane.f32.xlu0 %v805_v25  ;;  %800 = vadd.xlane.f32.xlu1 %v799_v26 }
 0x430   :  { %v810_v28 = vpop.xlane.xlu0 %809  ;;  %v804_v29 = vpop.xlane.xlu1 %803 }
 0x431   :  { %2484 = vrsqrt.f32 %v810_v28  ;;  %vm834_vm3 = vcmp.eq.f32.partialorder %v810_v28, inf  ;;  %v837_v35 = vand.u32 2147483648, %v810_v28  ;;  %vm836_vm4 = vcmp.eq.f32.partialorder %v810_v28, 0.0 }
 0x432   :  { %2486 = vrsqrt.f32 %v804_v29  ;;  %vm820_vm5 = vcmp.eq.f32.partialorder %v804_v29, inf  ;;  %v823_v39 = vand.u32 2147483648, %v804_v29  ;;  %vm822_vm6 = vcmp.eq.f32.partialorder %v804_v29, 0.0 }
 0x434   :  { %v807_v30 = vpop.xlane.xlu0 %806  ;;  %v801_v31 = vpop.xlane.xlu1 %800 }
 0x435   :  { %2488 = vrsqrt.f32 %v807_v30  ;;  %vm827_vm7 = vcmp.eq.f32.partialorder %v807_v30, inf  ;;  %vm829_vm8 = vcmp.eq.f32.partialorder %v807_v30, 0.0  ;;  %v830_v48 = vand.u32 2147483648, %v807_v30 }
 0x436   :  { %2490 = vrsqrt.f32 %v801_v31  ;;  %vm813_vm9 = vcmp.eq.f32.partialorder %v801_v31, inf  ;;  %v816_v53 = vand.u32 2147483648, %v801_v31  ;;  %vm815_vm10 = vcmp.eq.f32.partialorder %v801_v31, 0.0 }
 0x43e   :  { %v2485_v32 = vpop.eup %2484 }
 0x43f   :  { %v2487_v33 = vpop.eup %2486  ;;  %v833_v34 = vmul.f32 %v2485_v32, %v810_v28 }
 0x440   :  { %v819_v36 = vmul.f32 %v2487_v33, %v804_v29 }
 0x441   :  { %v835_v38 = vsel %vm834_vm3, %v810_v28, %v833_v34 }
 0x442   :  { %v2489_v41 = vpop.eup %2488  ;;  %v821_v42 = vsel %vm820_vm5, %v804_v29, %v819_v36  ;;  %v838_v43 = vsel %vm836_vm4, %v837_v35, %v835_v38 }
 0x443   :  { %v2491_v44 = vpop.eup %2490  ;;  %v826_v45 = vmul.f32 %v2489_v41, %v807_v30  ;;  %v842_v46 = vadd.f32 %v838_v43, %v782_v37  ;;  %v824_v47 = vsel %vm822_vm6, %v823_v39, %v821_v42 }
 0x444   :  { %v812_v49 = vmul.f32 %v2491_v44, %v801_v31  ;;  %v840_v51 = vadd.f32 %v824_v47, %v780_v40 }
 0x445   :  { %v828_v52 = vsel %vm827_vm7, %v807_v30, %v826_v45  ;;  %2492 = vrcp.f32 %v842_v46 }
 0x446   :  { %v814_v55 = vsel %vm813_vm9, %v801_v31, %v812_v49  ;;  %v831_v56 = vsel %vm829_vm8, %v830_v48, %v828_v52  ;;  %2494 = vrcp.f32 %v840_v51 }
 0x447   :  { %v841_v57 = vadd.f32 %v831_v56, %v781_v50  ;;  %v817_v58 = vsel %vm815_vm10, %v816_v53, %v814_v55 }
 0x448   :  { %v839_v59 = vadd.f32 %v817_v58, %v779_v54  ;;  %v2179_v58 = vld [vmem:[%s3741_s10 + $0x38] sm:$0xff] }
 0x449   :  { %2496 = vrcp.f32 %v841_v57 }
 0x44a   :  { %2498 = vrcp.f32 %v839_v59 }
 0x452   :  { %v2493_v62 = vpop.eup %2492 }
 0x453   :  { %v2495_v63 = vpop.eup %2494  ;;  %v854_v0 = vmul.f32 %v2493_v62, %v786_v60  ;;  %v878_v1 = vmul.f32 %v2493_v62, %v782_v37 }
 0x454   :  { %v852_v3 = vmul.f32 %v2495_v63, %v784_v61  ;;  %v876_v4 = vmul.f32 %v2495_v63, %v780_v40  ;;  %v2178_v63 = vld [vmem:[%s3741_s10 + $0x30] sm:$0xff] }
 0x455   :  { %v858_v5 = vadd.f32 1.0, %v854_v0  ;;  %v882_v6 = vmul.f32 %v878_v1, %v854_v0  ;;  %916 = vperm.xlu0 %2480, %v854_v0  }
 0x456   :  { %v2497_v8 = vpop.eup %2496  ;;  %v856_v9 = vadd.f32 1.0, %v852_v3  ;;  %v880_v10 = vmul.f32 %v876_v4, %v852_v3 }
 0x457   :  { %v2499_v19 = vpop.eup %2498  ;;  %2500 = vlog2.f32 %v858_v5  ;;  %v886_v20 = vadd.f32 1.0, %v882_v6  ;;  %v853_v21 = vmul.f32 %v2497_v8, %v785_v2  ;;  %v877_v22 = vmul.f32 %v2497_v8, %v781_v50  ;;  %v2176_v8 = vld [vmem:[%s3741_s10 + $0x20] sm:$0xff] }
 0x458   :  { %2502 = vlog2.f32 %v856_v9  ;;  %v884_v23 = vadd.f32 1.0, %v880_v10  ;;  %v851_v24 = vmul.f32 %v2499_v19, %v783_v7  ;;  %v875_v25 = vmul.f32 %v2499_v19, %v779_v54 }
 0x459   :  { %2504 = vlog2.f32 %v886_v20  ;;  %v857_v26 = vadd.f32 1.0, %v853_v21  ;;  %v881_v27 = vmul.f32 %v877_v22, %v853_v21  ;;  %911 = vperm.xlu1 %2481, %v853_v21  }
 0x45a   :  { %2506 = vlog2.f32 %v884_v23  ;;  %v855_v28 = vadd.f32 1.0, %v851_v24  ;;  %v879_v29 = vmul.f32 %v875_v25, %v851_v24 }
 0x45b   :  { %2508 = vlog2.f32 %v857_v26  ;;  %v885_v30 = vadd.f32 1.0, %v881_v27  ;;  %v2171_v27 = vld [vmem:[%s3742_s11 + $0x38] sm:$0xff] }
 0x45c   :  { %2510 = vlog2.f32 %v855_v28  ;;  %v883_v31 = vadd.f32 1.0, %v879_v29 }
 0x45d   :  { %2512 = vlog2.f32 %v885_v30  ;;  %906 = vperm.xlu1 %2481, %v852_v3   ;;  %v2177_v3 = vld [vmem:[%s3741_s10 + $0x28] sm:$0xff] }
 0x45e   :  { %2514 = vlog2.f32 %v883_v31 }
 0x461   :  { %901 = vperm.xlu1 %2481, %v851_v24  }
 0x464   :  { %v2501_v32 = vpop.eup %2500 }
 0x465   :  { %v2503_v33 = vpop.eup %2502  ;;  %v866_v34 = vmul.f32 0.6931472, %v2501_v32 }
 0x466   :  { %v2505_v35 = vpop.eup %2504  ;;  %v862_v36 = vmul.f32 0.6931472, %v2503_v33 }
 0x467   :  { %v2507_v37 = vpop.eup %2506  ;;  %v870_v38 = vmul.f32 15.0, %v866_v34  ;;  %v894_v39 = vmul.f32 0.6931472, %v2505_v35  ;;  %v2170_v34 = vld [vmem:[%s3742_s11 + $0x30] sm:$0xff] }
 0x468   :  { %v2509_v40 = vpop.eup %2508  ;;  %v868_v41 = vmul.f32 15.0, %v862_v36  ;;  %v890_v42 = vmul.f32 0.6931472, %v2507_v37 }
 0x469   :  { %v2511_v43 = vpop.eup %2510  ;;  %v3084_v44 = vadd.f32 %v894_v39, %v870_v38  ;;  %v864_v45 = vmul.f32 0.6931472, %v2509_v40 }
 0x46a   :  { %v2513_v46 = vpop.eup %2512  ;;  %v3086_v47 = vadd.f32 %v890_v42, %v868_v41  ;;  %v860_v48 = vmul.f32 0.6931472, %v2511_v43  ;;  %v2169_v41 = vld [vmem:[%s3742_s11 + $0x28] sm:$0xff] }
 0x46b   :  { %v2515_v49 = vpop.eup %2514  ;;  %v869_v50 = vmul.f32 15.0, %v864_v45  ;;  %v892_v51 = vmul.f32 0.6931472, %v2513_v46 }
 0x46c   :  { %v867_v52 = vmul.f32 15.0, %v860_v48  ;;  %v888_v53 = vmul.f32 0.6931472, %v2515_v49 }
 0x46d   :  { %v3088_v54 = vadd.f32 %v892_v51, %v869_v50  ;;  %v2168_v50 = vld [vmem:[%s3742_s11 + $0x20] sm:$0xff] }
 0x46e   :  { %v3090_v55 = vadd.f32 %v888_v53, %v867_v52 }
 0x4d0   :  { %v917_v56 = vpop.permute.xlu0 %916 }
 0x4d1   :  { %v922_v57 = vmul.f32 %v917_v56, %v3037_v15  ;;  %v2175_v56 = vld [vmem:[%s3743_s12 + $0x38] sm:$0xff] }
 0x4d3   :  { %v3097_v59 = vadd.f32 %v922_v57, %v3028_v11 }
 0x4d4   :  { %v912_v60 = vpop.permute.xlu1 %911 }
 0x4d5   :  { %v921_v61 = vmul.f32 %v912_v60, %v3043_v17  ;;  %v3101_v62 = vsub.f32 %v3097_v59, %v2179_v58 }
 0x4d7   :  { %v3107_v0 = vadd.f32 %v921_v61, %v3032_v13  ;;  %v949_v15 = vmul.f32 %v3101_v62, %v3101_v62  ;;  %v2174_v61 = vld [vmem:[%s3743_s12 + $0x30] sm:$0xff] }
 0x4d8   :  { %v907_v1 = vpop.permute.xlu1 %906 }
 0x4d9   :  { %v920_v11 = vmul.f32 %v907_v1, %v3040_v16  ;;  %v959_v2 = vsel %vm713_vm2, %v949_v15, 0.0  ;;  %v3114_v17 = vsub.f32 %v3107_v0, %v2178_v63 }
 0x4da   :  { %960 = vadd.xlane.f32.xlu1 %v959_v2 }
 0x4db   :  { %v3120_v4 = vadd.f32 %v920_v11, %v3030_v12  ;;  %v948_v13 = vmul.f32 %v3114_v17, %v3114_v17 }
 0x4dc   :  { %v902_v5 = vpop.permute.xlu1 %901 }
 0x4dd   :  { %v919_v6 = vmul.f32 %v902_v5, %v3046_v18  ;;  %v956_v16 = vsel %vm713_vm2, %v948_v13, 0.0  ;;  %v3127_v7 = vsub.f32 %v3120_v4, %v2177_v3  ;;  %v2173_v13 = vld [vmem:[%s3743_s12 + $0x28] sm:$0xff] }
 0x4de   :  { %957 = vadd.xlane.f32.xlu0 %v956_v16 }
 0x4df   :  { %v3133_v9 = vadd.f32 %v919_v6, %v3034_v14  ;;  %v947_v12 = vmul.f32 %v3127_v7, %v3127_v7 }
 0x4e1   :  { %v953_v10 = vsel %vm713_vm2, %v947_v12, 0.0  ;;  %v3139_v18 = vsub.f32 %v3133_v9, %v2176_v8 }
 0x4e2   :  { %954 = vadd.xlane.f32.xlu1 %v953_v10 }
 0x4e3   :  { %v946_v19 = vmul.f32 %v3139_v18, %v3139_v18 }
 0x4e5   :  { %v950_v20 = vsel %vm713_vm2, %v946_v19, 0.0  ;;  %v2172_v19 = vld [vmem:[%s3743_s12 + $0x20] sm:$0xff] }
 0x4e6   :  { %951 = vadd.xlane.f32.xlu1 %v950_v20 }
 0x563   :  { %v961_v21 = vpop.xlane.xlu1 %960 }
 0x564   :  { %2516 = vrsqrt.f32 %v961_v21  ;;  %vm985_vm11 = vcmp.eq.f32.partialorder %v961_v21, inf  ;;  %v988_v26 = vand.u32 2147483648, %v961_v21  ;;  %vm987_vm12 = vcmp.eq.f32.partialorder %v961_v21, 0.0 }
 0x567   :  { %v958_v22 = vpop.xlane.xlu0 %957 }
 0x568   :  { %2518 = vrsqrt.f32 %v958_v22  ;;  %vm978_vm13 = vcmp.eq.f32.partialorder %v958_v22, inf  ;;  %v981_v33 = vand.u32 2147483648, %v958_v22  ;;  %vm980_vm14 = vcmp.eq.f32.partialorder %v958_v22, 0.0 }
 0x56b   :  { %v955_v14 = vpop.xlane.xlu1 %954 }
 0x56c   :  { %2520 = vrsqrt.f32 %v955_v14  ;;  %vm971_vm15 = vcmp.eq.f32.partialorder %v955_v14, inf  ;;  %v974_v40 = vand.u32 2147483648, %v955_v14  ;;  %vm973_vm1 = vcmp.eq.f32.partialorder %v955_v14, 0.0 }
 0x56f   :  { %v952_v23 = vpop.xlane.xlu1 %951 }
 0x570   :  { %2522 = vrsqrt.f32 %v952_v23  ;;  %vm964_vm3 = vcmp.eq.f32.partialorder %v952_v23, inf  ;;  %v967_v49 = vand.u32 2147483648, %v952_v23  ;;  %vm966_vm4 = vcmp.eq.f32.partialorder %v952_v23, 0.0 }
 0x571   :  { %v2517_v24 = vpop.eup %2516 }
 0x572   :  { %v984_v25 = vmul.f32 %v2517_v24, %v961_v21 }
 0x574   :  { %v986_v28 = vsel %vm985_vm11, %v961_v21, %v984_v25 }
 0x575   :  { %v2519_v29 = vpop.eup %2518  ;;  %v989_v30 = vsel %vm987_vm12, %v988_v26, %v986_v28 }
 0x576   :  { %v977_v31 = vmul.f32 %v2519_v29, %v958_v22  ;;  %v993_v32 = vadd.f32 %v2171_v27, %v989_v30 }
 0x578   :  { %v979_v35 = vsel %vm978_vm13, %v958_v22, %v977_v31  ;;  %2524 = vrcp.f32 %v993_v32 }
 0x579   :  { %v2521_v36 = vpop.eup %2520  ;;  %v982_v37 = vsel %vm980_vm14, %v981_v33, %v979_v35 }
 0x57a   :  { %v970_v38 = vmul.f32 %v2521_v36, %v955_v14  ;;  %v992_v39 = vadd.f32 %v2170_v34, %v982_v37 }
 0x57c   :  { %v972_v42 = vsel %vm971_vm15, %v955_v14, %v970_v38  ;;  %2526 = vrcp.f32 %v992_v39 }
 0x57d   :  { %v2523_v43 = vpop.eup %2522  ;;  %v975_v45 = vsel %vm973_vm1, %v974_v40, %v972_v42 }
 0x57e   :  { %v963_v46 = vmul.f32 %v2523_v43, %v952_v23  ;;  %v991_v48 = vadd.f32 %v2169_v41, %v975_v45 }
 0x580   :  { %v965_v51 = vsel %vm964_vm3, %v952_v23, %v963_v46  ;;  %2528 = vrcp.f32 %v991_v48 }
 0x581   :  { %v968_v52 = vsel %vm966_vm4, %v967_v49, %v965_v51 }
 0x582   :  { %v990_v53 = vadd.f32 %v2168_v50, %v968_v52 }
 0x584   :  { %2530 = vrcp.f32 %v990_v53 }
 0x585   :  { %v2525_v57 = vpop.eup %2524 }
 0x586   :  { %v1005_v58 = vmul.f32 %v2525_v57, %v2175_v56  ;;  %v1029_v60 = vmul.f32 %v2525_v57, %v2171_v27 }
 0x588   :  { %1067 = vperm.xlu1 %2481, %v1005_v58   ;;  %v1009_v63 = vadd.f32 1.0, %v1005_v58  ;;  %v1033_v15 = vmul.f32 %v1029_v60, %v1005_v58 }
 0x589   :  { %v2527_v1 = vpop.eup %2526 }
 0x58a   :  { %2532 = vlog2.f32 %v1009_v63  ;;  %v1037_v11 = vadd.f32 1.0, %v1033_v15  ;;  %v1004_v2 = vmul.f32 %v2527_v1, %v2174_v61  ;;  %v1028_v3 = vmul.f32 %v2527_v1, %v2170_v34  ;;  %v2191_v61 = vld [vmem:[%s3741_s10 + $0x58] sm:$0xff] }
 0x58c   :  { %2534 = vlog2.f32 %v1037_v11  ;;  %1062 = vperm.xlu0 %2480, %v1004_v2   ;;  %v1008_v5 = vadd.f32 1.0, %v1004_v2  ;;  %v1032_v6 = vmul.f32 %v1028_v3, %v1004_v2 }
 0x58d   :  { %v2529_v16 = vpop.eup %2528 }
 0x58e   :  { %2536 = vlog2.f32 %v1008_v5  ;;  %v1036_v8 = vadd.f32 1.0, %v1032_v6  ;;  %v1003_v12 = vmul.f32 %v2529_v16, %v2173_v13  ;;  %v1027_v10 = vmul.f32 %v2529_v16, %v2169_v41  ;;  %v2189_v13 = vld [vmem:[%s3741_s10 + $0x48] sm:$0xff] }
 0x590   :  { %2538 = vlog2.f32 %v1036_v8  ;;  %1057 = vperm.xlu1 %2481, %v1003_v12   ;;  %v1007_v20 = vadd.f32 1.0, %v1003_v12  ;;  %v1031_v21 = vmul.f32 %v1027_v10, %v1003_v12  ;;  %v2188_v12 = vld [vmem:[%s3741_s10 + $0x40] sm:$0xff] }
 0x591   :  { %v2531_v22 = vpop.eup %2530 }
 0x592   :  { %2540 = vlog2.f32 %v1007_v20  ;;  %v1035_v14 = vadd.f32 1.0, %v1031_v21  ;;  %v1002_v23 = vmul.f32 %v2531_v22, %v2172_v19  ;;  %v1026_v24 = vmul.f32 %v2531_v22, %v2168_v50 }
 0x594   :  { %2542 = vlog2.f32 %v1035_v14  ;;  %1052 = vperm.xlu1 %2481, %v1002_v23   ;;  %v1006_v25 = vadd.f32 1.0, %v1002_v23  ;;  %v1030_v26 = vmul.f32 %v1026_v24, %v1002_v23 }
 0x596   :  { %2544 = vlog2.f32 %v1006_v25  ;;  %v1034_v27 = vadd.f32 1.0, %v1030_v26 }
 0x597   :  { %v2533_v28 = vpop.eup %2532 }
 0x598   :  { %v1017_v29 = vmul.f32 0.6931472, %v2533_v28  ;;  %2546 = vlog2.f32 %v1034_v27  ;;  %v2183_v27 = vld [vmem:[%s3742_s11 + $0x58] sm:$0xff] }
 0x599   :  { %v2535_v30 = vpop.eup %2534 }
 0x59a   :  { %v1021_v31 = vmul.f32 15.0, %v1017_v29  ;;  %v1045_v34 = vmul.f32 0.6931472, %v2535_v30 }
 0x59b   :  { %v2537_v32 = vpop.eup %2536 }
 0x59c   :  { %v1025_v33 = vadd.f32 %v1021_v31, %v3084_v44  ;;  %v1015_v35 = vmul.f32 0.6931472, %v2537_v32 }
 0x59d   :  { %v2539_v36 = vpop.eup %2538 }
 0x59e   :  { %v3169_v37 = vadd.f32 %v1045_v34, %v1025_v33  ;;  %v1020_v38 = vmul.f32 15.0, %v1015_v35  ;;  %v1043_v41 = vmul.f32 0.6931472, %v2539_v36  ;;  %v2182_v34 = vld [vmem:[%s3742_s11 + $0x50] sm:$0xff] }
 0x59f   :  { %v2541_v39 = vpop.eup %2540 }
 0x5a0   :  { %v1024_v40 = vadd.f32 %v1020_v38, %v3088_v54  ;;  %v1013_v42 = vmul.f32 0.6931472, %v2541_v39 }
 0x5a1   :  { %v2543_v43 = vpop.eup %2542 }
 0x5a2   :  { %v3172_v45 = vadd.f32 %v1043_v41, %v1024_v40  ;;  %v1019_v46 = vmul.f32 15.0, %v1013_v42  ;;  %v1041_v50 = vmul.f32 0.6931472, %v2543_v43  ;;  %v2181_v42 = vld [vmem:[%s3742_s11 + $0x48] sm:$0xff] }
 0x5a3   :  { %v2545_v48 = vpop.eup %2544 }
 0x5a4   :  { %v1023_v49 = vadd.f32 %v1019_v46, %v3086_v47  ;;  %v1011_v44 = vmul.f32 0.6931472, %v2545_v48 }
 0x5a5   :  { %v2547_v51 = vpop.eup %2546 }
 0x5a6   :  { %v3175_v52 = vadd.f32 %v1041_v50, %v1023_v49  ;;  %v1018_v53 = vmul.f32 15.0, %v1011_v44  ;;  %v1039_v57 = vmul.f32 0.6931472, %v2547_v51  ;;  %v2180_v51 = vld [vmem:[%s3742_s11 + $0x40] sm:$0xff] }
 0x5a8   :  { %v1022_v56 = vadd.f32 %v1018_v53, %v3090_v55  ;;  %v2190_v55 = vld [vmem:[%s3741_s10 + $0x50] sm:$0xff] }
 0x5aa   :  { %v3178_v58 = vadd.f32 %v1039_v57, %v1022_v56 }
 0x603   :  { %v1068_v54 = vpop.permute.xlu1 %1067 }
 0x604   :  { %v1073_v60 = vmul.f32 %v1068_v54, %v3101_v62  ;;  %v2187_v54 = vld [vmem:[%s3743_s12 + $0x58] sm:$0xff] }
 0x606   :  { %v3185_v47 = vadd.f32 %v1073_v60, %v3097_v59 }
 0x607   :  { %v1063_v63 = vpop.permute.xlu0 %1062 }
 0x608   :  { %v1072_v15 = vmul.f32 %v1063_v63, %v3114_v17  ;;  %v3189_v1 = vsub.f32 %v3185_v47, %v2191_v61 }
 0x60a   :  { %v3195_v11 = vadd.f32 %v1072_v15, %v3107_v0  ;;  %v1100_v62 = vmul.f32 %v3189_v1, %v3189_v1  ;;  %v2186_v15 = vld [vmem:[%s3743_s12 + $0x50] sm:$0xff] }
 0x60b   :  { %v1058_v2 = vpop.permute.xlu1 %1057 }
 0x60c   :  { %v1071_v59 = vmul.f32 %v1058_v2, %v3127_v7  ;;  %v1110_v3 = vsel %vm713_vm2, %v1100_v62, 0.0  ;;  %v3202_v17 = vsub.f32 %v3195_v11, %v2190_v55 }
 0x60d   :  { %1111 = vadd.xlane.f32.xlu1 %v1110_v3 }
 0x60e   :  { %v3208_v5 = vadd.f32 %v1071_v59, %v3120_v4  ;;  %v1099_v0 = vmul.f32 %v3202_v17, %v3202_v17 }
 0x60f   :  { %v1053_v6 = vpop.permute.xlu1 %1052 }
 0x610   :  { %v1070_v16 = vmul.f32 %v1053_v6, %v3139_v18  ;;  %v1107_v7 = vsel %vm713_vm2, %v1099_v0, 0.0  ;;  %v3215_v8 = vsub.f32 %v3208_v5, %v2189_v13  ;;  %v2185_v0 = vld [vmem:[%s3743_s12 + $0x48] sm:$0xff] }
 0x611   :  { %1108 = vadd.xlane.f32.xlu0 %v1107_v7 }
 0x612   :  { %v3221_v10 = vadd.f32 %v1070_v16, %v3133_v9  ;;  %v1098_v4 = vmul.f32 %v3215_v8, %v3215_v8 }
 0x614   :  { %v1104_v19 = vsel %vm713_vm2, %v1098_v4, 0.0  ;;  %v3227_v18 = vsub.f32 %v3221_v10, %v2188_v12 }
 0x615   :  { %1105 = vadd.xlane.f32.xlu0 %v1104_v19 }
 0x616   :  { %v1097_v20 = vmul.f32 %v3227_v18, %v3227_v18 }
 0x618   :  { %v1101_v21 = vsel %vm713_vm2, %v1097_v20, 0.0  ;;  %v2184_v20 = vld [vmem:[%s3743_s12 + $0x40] sm:$0xff] }
 0x619   :  { %1102 = vadd.xlane.f32.xlu1 %v1101_v21 }
 0x696   :  { %v1112_v22 = vpop.xlane.xlu1 %1111 }
 0x697   :  { %2548 = vrsqrt.f32 %v1112_v22  ;;  %vm1136_vm5 = vcmp.eq.f32.partialorder %v1112_v22, inf  ;;  %v1139_v26 = vand.u32 2147483648, %v1112_v22  ;;  %vm1138_vm6 = vcmp.eq.f32.partialorder %v1112_v22, 0.0 }
 0x69a   :  { %v1109_v14 = vpop.xlane.xlu0 %1108 }
 0x69b   :  { %2550 = vrsqrt.f32 %v1109_v14  ;;  %vm1129_vm7 = vcmp.eq.f32.partialorder %v1109_v14, inf  ;;  %v1132_v33 = vand.u32 2147483648, %v1109_v14  ;;  %vm1131_vm8 = vcmp.eq.f32.partialorder %v1109_v14, 0.0 }
 0x69e   :  { %v1106_v9 = vpop.xlane.xlu0 %1105 }
 0x69f   :  { %2552 = vrsqrt.f32 %v1106_v9  ;;  %vm1122_vm9 = vcmp.eq.f32.partialorder %v1106_v9, inf  ;;  %v1125_v41 = vand.u32 2147483648, %v1106_v9  ;;  %vm1124_vm10 = vcmp.eq.f32.partialorder %v1106_v9, 0.0 }
 0x6a2   :  { %v1103_v23 = vpop.xlane.xlu1 %1102 }
 0x6a3   :  { %2554 = vrsqrt.f32 %v1103_v23  ;;  %vm1115_vm11 = vcmp.eq.f32.partialorder %v1103_v23, inf  ;;  %v1118_v44 = vand.u32 2147483648, %v1103_v23  ;;  %vm1117_vm12 = vcmp.eq.f32.partialorder %v1103_v23, 0.0 }
 0x6a4   :  { %v2549_v24 = vpop.eup %2548 }
 0x6a5   :  { %v1135_v25 = vmul.f32 %v2549_v24, %v1112_v22 }
 0x6a7   :  { %v1137_v28 = vsel %vm1136_vm5, %v1112_v22, %v1135_v25 }
 0x6a8   :  { %v2551_v29 = vpop.eup %2550  ;;  %v1140_v30 = vsel %vm1138_vm6, %v1139_v26, %v1137_v28 }
 0x6a9   :  { %v1128_v31 = vmul.f32 %v2551_v29, %v1109_v14  ;;  %v1144_v32 = vadd.f32 %v2183_v27, %v1140_v30 }
 0x6ab   :  { %v1130_v35 = vsel %vm1129_vm7, %v1109_v14, %v1128_v31  ;;  %2556 = vrcp.f32 %v1144_v32 }
 0x6ac   :  { %v2553_v36 = vpop.eup %2552  ;;  %v1133_v38 = vsel %vm1131_vm8, %v1132_v33, %v1130_v35 }
 0x6ad   :  { %v1121_v39 = vmul.f32 %v2553_v36, %v1106_v9  ;;  %v1143_v40 = vadd.f32 %v2182_v34, %v1133_v38 }
 0x6af   :  { %v1123_v43 = vsel %vm1122_vm9, %v1106_v9, %v1121_v39  ;;  %2558 = vrcp.f32 %v1143_v40 }
 0x6b0   :  { %v2555_v46 = vpop.eup %2554  ;;  %v1126_v48 = vsel %vm1124_vm10, %v1125_v41, %v1123_v43 }
 0x6b1   :  { %v1114_v49 = vmul.f32 %v2555_v46, %v1103_v23  ;;  %v1142_v50 = vadd.f32 %v2181_v42, %v1126_v48 }
 0x6b3   :  { %v1116_v53 = vsel %vm1115_vm11, %v1103_v23, %v1114_v49  ;;  %2560 = vrcp.f32 %v1142_v50 }
 0x6b4   :  { %v1119_v56 = vsel %vm1117_vm12, %v1118_v44, %v1116_v53 }
 0x6b5   :  { %v1141_v57 = vadd.f32 %v2180_v51, %v1119_v56 }
 0x6b7   :  { %2562 = vrcp.f32 %v1141_v57 }
 0x6b8   :  { %v2557_v60 = vpop.eup %2556 }
 0x6b9   :  { %v1156_v61 = vmul.f32 %v2557_v60, %v2187_v54  ;;  %v1180_v63 = vmul.f32 %v2557_v60, %v2183_v27 }
 0x6bb   :  { %1218 = vperm.xlu0 %2480, %v1156_v61   ;;  %v1160_v55 = vadd.f32 1.0, %v1156_v61  ;;  %v1184_v62 = vmul.f32 %v1180_v63, %v1156_v61 }
 0x6bc   :  { %v2559_v2 = vpop.eup %2558 }
 0x6bd   :  { %2564 = vlog2.f32 %v1160_v55  ;;  %v1188_v59 = vadd.f32 1.0, %v1184_v62  ;;  %v1155_v3 = vmul.f32 %v2559_v2, %v2186_v15  ;;  %v1179_v13 = vmul.f32 %v2559_v2, %v2182_v34  ;;  %v2203_v15 = vld [vmem:[%s3741_s10 + $0x78] sm:$0xff] }
 0x6bf   :  { %2566 = vlog2.f32 %v1188_v59  ;;  %v1159_v6 = vadd.f32 1.0, %v1155_v3  ;;  %v1183_v16 = vmul.f32 %v1179_v13, %v1155_v3  ;;  %1213 = vperm.xlu1 %2481, %v1155_v3  }
 0x6c0   :  { %v2561_v7 = vpop.eup %2560 }
 0x6c1   :  { %2568 = vlog2.f32 %v1159_v6  ;;  %v1187_v12 = vadd.f32 1.0, %v1183_v16  ;;  %v1154_v4 = vmul.f32 %v2561_v7, %v2185_v0  ;;  %v1178_v19 = vmul.f32 %v2561_v7, %v2181_v42  ;;  %v2201_v0 = vld [vmem:[%s3741_s10 + $0x68] sm:$0xff] }
 0x6c3   :  { %2570 = vlog2.f32 %v1187_v12  ;;  %v1158_v21 = vadd.f32 1.0, %v1154_v4  ;;  %v1182_v22 = vmul.f32 %v1178_v19, %v1154_v4  ;;  %1208 = vperm.xlu1 %2481, %v1154_v4   ;;  %v2200_v4 = vld [vmem:[%s3741_s10 + $0x60] sm:$0xff] }
 0x6c4   :  { %v2563_v14 = vpop.eup %2562 }
 0x6c5   :  { %2572 = vlog2.f32 %v1158_v21  ;;  %v1186_v9 = vadd.f32 1.0, %v1182_v22  ;;  %v1153_v23 = vmul.f32 %v2563_v14, %v2184_v20  ;;  %v1177_v24 = vmul.f32 %v2563_v14, %v2180_v51 }
 0x6c7   :  { %2574 = vlog2.f32 %v1186_v9  ;;  %1203 = vperm.xlu0 %2480, %v1153_v23   ;;  %v1157_v25 = vadd.f32 1.0, %v1153_v23  ;;  %v1181_v26 = vmul.f32 %v1177_v24, %v1153_v23 }
 0x6c9   :  { %2576 = vlog2.f32 %v1157_v25  ;;  %v1185_v27 = vadd.f32 1.0, %v1181_v26 }
 0x6ca   :  { %v2565_v28 = vpop.eup %2564 }
 0x6cb   :  { %v1168_v29 = vmul.f32 0.6931472, %v2565_v28  ;;  %2578 = vlog2.f32 %v1185_v27  ;;  %v2195_v27 = vld [vmem:[%s3742_s11 + $0x78] sm:$0xff] }
 0x6cc   :  { %v2567_v30 = vpop.eup %2566 }
 0x6cd   :  { %v1172_v31 = vmul.f32 15.0, %v1168_v29  ;;  %v1196_v34 = vmul.f32 0.6931472, %v2567_v30 }
 0x6ce   :  { %v2569_v32 = vpop.eup %2568 }
 0x6cf   :  { %v1176_v33 = vadd.f32 %v1172_v31, %v3169_v37  ;;  %v1166_v35 = vmul.f32 0.6931472, %v2569_v32 }
 0x6d0   :  { %v2571_v36 = vpop.eup %2570 }
 0x6d1   :  { %v3257_v38 = vadd.f32 %v1196_v34, %v1176_v33  ;;  %v1171_v39 = vmul.f32 15.0, %v1166_v35  ;;  %v1194_v42 = vmul.f32 0.6931472, %v2571_v36  ;;  %v2194_v34 = vld [vmem:[%s3742_s11 + $0x70] sm:$0xff] }
 0x6d2   :  { %v2573_v40 = vpop.eup %2572 }
 0x6d3   :  { %v1175_v41 = vadd.f32 %v1171_v39, %v3172_v45  ;;  %v1164_v43 = vmul.f32 0.6931472, %v2573_v40 }
 0x6d4   :  { %v2575_v46 = vpop.eup %2574 }
 0x6d5   :  { %v3260_v48 = vadd.f32 %v1194_v42, %v1175_v41  ;;  %v1170_v49 = vmul.f32 15.0, %v1164_v43  ;;  %v1192_v51 = vmul.f32 0.6931472, %v2575_v46  ;;  %v2193_v43 = vld [vmem:[%s3742_s11 + $0x68] sm:$0xff] }
 0x6d6   :  { %v2577_v50 = vpop.eup %2576 }
 0x6d7   :  { %v1174_v44 = vadd.f32 %v1170_v49, %v3175_v52  ;;  %v1162_v37 = vmul.f32 0.6931472, %v2577_v50 }
 0x6d8   :  { %v2579_v53 = vpop.eup %2578 }
 0x6d9   :  { %v3263_v56 = vadd.f32 %v1192_v51, %v1174_v44  ;;  %v1169_v57 = vmul.f32 15.0, %v1162_v37  ;;  %v1190_v60 = vmul.f32 0.6931472, %v2579_v53  ;;  %v2192_v53 = vld [vmem:[%s3742_s11 + $0x60] sm:$0xff] }
 0x6db   :  { %v1173_v54 = vadd.f32 %v1169_v57, %v3178_v58  ;;  %v2202_v58 = vld [vmem:[%s3741_s10 + $0x70] sm:$0xff] }
 0x6dd   :  { %v3266_v61 = vadd.f32 %v1190_v60, %v1173_v54 }
 0x736   :  { %v1219_v45 = vpop.permute.xlu0 %1218 }
 0x737   :  { %v1224_v63 = vmul.f32 %v1219_v45, %v3189_v1  ;;  %v2199_v45 = vld [vmem:[%s3743_s12 + $0x78] sm:$0xff] }
 0x739   :  { %v3273_v52 = vadd.f32 %v1224_v63, %v3185_v47 }
 0x73a   :  { %v1214_v55 = vpop.permute.xlu1 %1213 }
 0x73b   :  { %v1223_v62 = vmul.f32 %v1214_v55, %v3202_v17  ;;  %v3277_v2 = vsub.f32 %v3273_v52, %v2203_v15 }
 0x73d   :  { %v3283_v59 = vadd.f32 %v1223_v62, %v3195_v11  ;;  %v1251_v1 = vmul.f32 %v3277_v2, %v3277_v2  ;;  %v2198_v62 = vld [vmem:[%s3743_s12 + $0x70] sm:$0xff] }
 0x73e   :  { %v1209_v3 = vpop.permute.xlu1 %1208 }
 0x73f   :  { %v1222_v47 = vmul.f32 %v1209_v3, %v3215_v8  ;;  %v1261_v13 = vsel %vm713_vm2, %v1251_v1, 0.0  ;;  %v3290_v17 = vsub.f32 %v3283_v59, %v2202_v58 }
 0x740   :  { %1262 = vadd.xlane.f32.xlu1 %v1261_v13 }
 0x741   :  { %v3296_v6 = vadd.f32 %v1222_v47, %v3208_v5  ;;  %v1250_v11 = vmul.f32 %v3290_v17, %v3290_v17 }
 0x742   :  { %v1204_v16 = vpop.permute.xlu0 %1203 }
 0x743   :  { %v1221_v7 = vmul.f32 %v1204_v16, %v3227_v18  ;;  %v1258_v8 = vsel %vm713_vm2, %v1250_v11, 0.0  ;;  %v3303_v12 = vsub.f32 %v3296_v6, %v2201_v0  ;;  %v2197_v11 = vld [vmem:[%s3743_s12 + $0x68] sm:$0xff] }
 0x744   :  { %1259 = vadd.xlane.f32.xlu0 %v1258_v8 }
 0x745   :  { %v3309_v19 = vadd.f32 %v1221_v7, %v3221_v10  ;;  %v1249_v5 = vmul.f32 %v3303_v12, %v3303_v12 }
 0x747   :  { %v1255_v20 = vsel %vm713_vm2, %v1249_v5, 0.0  ;;  %v3315_v18 = vsub.f32 %v3309_v19, %v2200_v4 }
 0x748   :  { %1256 = vadd.xlane.f32.xlu0 %v1255_v20 }
 0x749   :  { %v1248_v21 = vmul.f32 %v3315_v18, %v3315_v18 }
 0x74b   :  { %v1252_v22 = vsel %vm713_vm2, %v1248_v21, 0.0  ;;  %v2196_v21 = vld [vmem:[%s3743_s12 + $0x60] sm:$0xff] }
 0x74c   :  { %1253 = vadd.xlane.f32.xlu1 %v1252_v22 }
 0x7c9   :  { %v1263_v14 = vpop.xlane.xlu1 %1262 }
 0x7ca   :  { %2580 = vrsqrt.f32 %v1263_v14  ;;  %vm1287_vm13 = vcmp.eq.f32.partialorder %v1263_v14, inf  ;;  %v1290_v26 = vand.u32 2147483648, %v1263_v14  ;;  %vm1289_vm14 = vcmp.eq.f32.partialorder %v1263_v14, 0.0 }
 0x7cd   :  { %v1260_v9 = vpop.xlane.xlu0 %1259 }
 0x7ce   :  { %2582 = vrsqrt.f32 %v1260_v9  ;;  %vm1280_vm15 = vcmp.eq.f32.partialorder %v1260_v9, inf  ;;  %v1283_v33 = vand.u32 2147483648, %v1260_v9  ;;  %vm1282_vm1 = vcmp.eq.f32.partialorder %v1260_v9, 0.0 }
 0x7d1   :  { %v1257_v10 = vpop.xlane.xlu0 %1256 }
 0x7d2   :  { %2584 = vrsqrt.f32 %v1257_v10  ;;  %vm1273_vm3 = vcmp.eq.f32.partialorder %v1257_v10, inf  ;;  %v1276_v42 = vand.u32 2147483648, %v1257_v10  ;;  %vm1275_vm4 = vcmp.eq.f32.partialorder %v1257_v10, 0.0 }
 0x7d5   :  { %v1254_v23 = vpop.xlane.xlu1 %1253 }
 0x7d6   :  { %2586 = vrsqrt.f32 %v1254_v23  ;;  %vm1266_vm5 = vcmp.eq.f32.partialorder %v1254_v23, inf  ;;  %v1269_v37 = vand.u32 2147483648, %v1254_v23  ;;  %vm1268_vm6 = vcmp.eq.f32.partialorder %v1254_v23, 0.0 }
 0x7d7   :  { %v2581_v24 = vpop.eup %2580 }
 0x7d8   :  { %v1286_v25 = vmul.f32 %v2581_v24, %v1263_v14 }
 0x7da   :  { %v1288_v28 = vsel %vm1287_vm13, %v1263_v14, %v1286_v25 }
 0x7db   :  { %v2583_v29 = vpop.eup %2582  ;;  %v1291_v30 = vsel %vm1289_vm14, %v1290_v26, %v1288_v28 }
 0x7dc   :  { %v1279_v31 = vmul.f32 %v2583_v29, %v1260_v9  ;;  %v1295_v32 = vadd.f32 %v2195_v27, %v1291_v30 }
 0x7de   :  { %v1281_v35 = vsel %vm1280_vm15, %v1260_v9, %v1279_v31  ;;  %2588 = vrcp.f32 %v1295_v32 }
 0x7df   :  { %v2585_v36 = vpop.eup %2584  ;;  %v1284_v39 = vsel %vm1282_vm1, %v1283_v33, %v1281_v35 }
 0x7e0   :  { %v1272_v40 = vmul.f32 %v2585_v36, %v1257_v10  ;;  %v1294_v41 = vadd.f32 %v2194_v34, %v1284_v39 }
 0x7e2   :  { %v1274_v46 = vsel %vm1273_vm3, %v1257_v10, %v1272_v40  ;;  %2590 = vrcp.f32 %v1294_v41 }
 0x7e3   :  { %v2587_v49 = vpop.eup %2586  ;;  %v1277_v50 = vsel %vm1275_vm4, %v1276_v42, %v1274_v46 }
 0x7e4   :  { %v1265_v44 = vmul.f32 %v2587_v49, %v1254_v23  ;;  %v1293_v51 = vadd.f32 %v2193_v43, %v1277_v50 }
 0x7e6   :  { %v1267_v57 = vsel %vm1266_vm5, %v1254_v23, %v1265_v44  ;;  %2592 = vrcp.f32 %v1293_v51 }
 0x7e7   :  { %v1270_v54 = vsel %vm1268_vm6, %v1269_v37, %v1267_v57 }
 0x7e8   :  { %v1292_v60 = vadd.f32 %v2192_v53, %v1270_v54 }
 0x7ea   :  { %2594 = vrcp.f32 %v1292_v60 }
 0x7eb   :  { %v2589_v63 = vpop.eup %2588 }
 0x7ec   :  { %v1307_v15 = vmul.f32 %v2589_v63, %v2199_v45  ;;  %v1331_v55 = vmul.f32 %v2589_v63, %v2195_v27 }
 0x7ee   :  { %1369 = vperm.xlu0 %2480, %v1307_v15   ;;  %v1311_v58 = vadd.f32 1.0, %v1307_v15  ;;  %v1335_v1 = vmul.f32 %v1331_v55, %v1307_v15 }
 0x7ef   :  { %v2591_v3 = vpop.eup %2590 }
 0x7f0   :  { %2596 = vlog2.f32 %v1311_v58  ;;  %v1339_v47 = vadd.f32 1.0, %v1335_v1  ;;  %v1306_v13 = vmul.f32 %v2591_v3, %v2198_v62  ;;  %v1330_v0 = vmul.f32 %v2591_v3, %v2194_v34  ;;  %v2215_v62 = vld [vmem:[%s3741_s10 + $0x98] sm:$0xff] }
 0x7f2   :  { %2598 = vlog2.f32 %v1339_v47  ;;  %1364 = vperm.xlu1 %2481, %v1306_v13   ;;  %v1310_v16 = vadd.f32 1.0, %v1306_v13  ;;  %v1334_v7 = vmul.f32 %v1330_v0, %v1306_v13 }
 0x7f3   :  { %v2593_v8 = vpop.eup %2592 }
 0x7f4   :  { %2600 = vlog2.f32 %v1310_v16  ;;  %v1338_v4 = vadd.f32 1.0, %v1334_v7  ;;  %v1305_v5 = vmul.f32 %v2593_v8, %v2197_v11  ;;  %v1329_v20 = vmul.f32 %v2593_v8, %v2193_v43  ;;  %v2213_v11 = vld [vmem:[%s3741_s10 + $0x88] sm:$0xff] }
 0x7f6   :  { %2602 = vlog2.f32 %v1338_v4  ;;  %1359 = vperm.xlu1 %2481, %v1305_v5   ;;  %v1309_v22 = vadd.f32 1.0, %v1305_v5  ;;  %v1333_v14 = vmul.f32 %v1329_v20, %v1305_v5  ;;  %v2212_v5 = vld [vmem:[%s3741_s10 + $0x80] sm:$0xff] }
 0x7f7   :  { %v2595_v9 = vpop.eup %2594 }
 0x7f8   :  { %2604 = vlog2.f32 %v1309_v22  ;;  %v1337_v10 = vadd.f32 1.0, %v1333_v14  ;;  %v1304_v23 = vmul.f32 %v2595_v9, %v2196_v21  ;;  %v1328_v24 = vmul.f32 %v2595_v9, %v2192_v53 }
 0x7fa   :  { %2606 = vlog2.f32 %v1337_v10  ;;  %1354 = vperm.xlu0 %2480, %v1304_v23   ;;  %v1308_v25 = vadd.f32 1.0, %v1304_v23  ;;  %v1332_v26 = vmul.f32 %v1328_v24, %v1304_v23 }
 0x7fc   :  { %2608 = vlog2.f32 %v1308_v25  ;;  %v1336_v27 = vadd.f32 1.0, %v1332_v26 }
 0x7fd   :  { %v2597_v28 = vpop.eup %2596 }
 0x7fe   :  { %v1319_v29 = vmul.f32 0.6931472, %v2597_v28  ;;  %2610 = vlog2.f32 %v1336_v27  ;;  %v2207_v27 = vld [vmem:[%s3742_s11 + $0x98] sm:$0xff] }
 0x7ff   :  { %v2599_v30 = vpop.eup %2598 }
 0x800   :  { %v1323_v31 = vmul.f32 15.0, %v1319_v29  ;;  %v1347_v34 = vmul.f32 0.6931472, %v2599_v30 }
 0x801   :  { %v2601_v32 = vpop.eup %2600 }
 0x802   :  { %v1327_v33 = vadd.f32 %v1323_v31, %v3257_v38  ;;  %v1317_v35 = vmul.f32 0.6931472, %v2601_v32 }
 0x803   :  { %v2603_v36 = vpop.eup %2602 }
 0x804   :  { %v3345_v39 = vadd.f32 %v1347_v34, %v1327_v33  ;;  %v1322_v40 = vmul.f32 15.0, %v1317_v35  ;;  %v1345_v43 = vmul.f32 0.6931472, %v2603_v36  ;;  %v2206_v34 = vld [vmem:[%s3742_s11 + $0x90] sm:$0xff] }
 0x805   :  { %v2605_v41 = vpop.eup %2604 }
 0x806   :  { %v1326_v42 = vadd.f32 %v1322_v40, %v3260_v48  ;;  %v1315_v46 = vmul.f32 0.6931472, %v2605_v41 }
 0x807   :  { %v2607_v49 = vpop.eup %2606 }
 0x808   :  { %v3348_v50 = vadd.f32 %v1345_v43, %v1326_v42  ;;  %v1321_v44 = vmul.f32 15.0, %v1315_v46  ;;  %v1343_v53 = vmul.f32 0.6931472, %v2607_v49  ;;  %v2205_v46 = vld [vmem:[%s3742_s11 + $0x88] sm:$0xff] }
 0x809   :  { %v2609_v51 = vpop.eup %2608 }
 0x80a   :  { %v1325_v37 = vadd.f32 %v1321_v44, %v3263_v56  ;;  %v1313_v38 = vmul.f32 0.6931472, %v2609_v51 }
 0x80b   :  { %v2611_v57 = vpop.eup %2610 }
 0x80c   :  { %v3351_v54 = vadd.f32 %v1343_v53, %v1325_v37  ;;  %v1320_v60 = vmul.f32 15.0, %v1313_v38  ;;  %v1341_v63 = vmul.f32 0.6931472, %v2611_v57  ;;  %v2204_v57 = vld [vmem:[%s3742_s11 + $0x80] sm:$0xff] }
 0x80e   :  { %v1324_v45 = vadd.f32 %v1320_v60, %v3266_v61  ;;  %v2214_v61 = vld [vmem:[%s3741_s10 + $0x90] sm:$0xff] }
 0x810   :  { %v3354_v15 = vadd.f32 %v1341_v63, %v1324_v45 }
 0x869   :  { %v1370_v48 = vpop.permute.xlu0 %1369 }
 0x86a   :  { %v1375_v55 = vmul.f32 %v1370_v48, %v3277_v2  ;;  %v2211_v48 = vld [vmem:[%s3743_s12 + $0x98] sm:$0xff] }
 0x86c   :  { %v3361_v56 = vadd.f32 %v1375_v55, %v3273_v52 }
 0x86d   :  { %v1365_v58 = vpop.permute.xlu1 %1364 }
 0x86e   :  { %v1374_v1 = vmul.f32 %v1365_v58, %v3290_v17  ;;  %v3365_v3 = vsub.f32 %v3361_v56, %v2215_v62 }
 0x870   :  { %v3371_v47 = vadd.f32 %v1374_v1, %v3283_v59  ;;  %v1402_v2 = vmul.f32 %v3365_v3, %v3365_v3  ;;  %v2210_v1 = vld [vmem:[%s3743_s12 + $0x90] sm:$0xff] }
 0x871   :  { %v1360_v13 = vpop.permute.xlu1 %1359 }
 0x872   :  { %v1373_v52 = vmul.f32 %v1360_v13, %v3303_v12  ;;  %v1412_v0 = vsel %vm713_vm2, %v1402_v2, 0.0  ;;  %v3378_v17 = vsub.f32 %v3371_v47, %v2214_v61 }
 0x873   :  { %1413 = vadd.xlane.f32.xlu1 %v1412_v0 }
 0x874   :  { %v3384_v16 = vadd.f32 %v1373_v52, %v3296_v6  ;;  %v1401_v59 = vmul.f32 %v3378_v17, %v3378_v17 }
 0x875   :  { %v1355_v7 = vpop.permute.xlu0 %1354 }
 0x876   :  { %v1372_v8 = vmul.f32 %v1355_v7, %v3315_v18  ;;  %v1409_v12 = vsel %vm713_vm2, %v1401_v59, 0.0  ;;  %v3391_v4 = vsub.f32 %v3384_v16, %v2213_v11  ;;  %v2209_v59 = vld [vmem:[%s3743_s12 + $0x88] sm:$0xff] }
 0x877   :  { %1410 = vadd.xlane.f32.xlu0 %v1409_v12 }
 0x878   :  { %v3397_v20 = vadd.f32 %v1372_v8, %v3309_v19  ;;  %v1400_v6 = vmul.f32 %v3391_v4, %v3391_v4 }
 0x87a   :  { %v1406_v21 = vsel %vm713_vm2, %v1400_v6, 0.0  ;;  %v3403_v18 = vsub.f32 %v3397_v20, %v2212_v5 }
 0x87b   :  { %1407 = vadd.xlane.f32.xlu0 %v1406_v21 }
 0x87c   :  { %v1399_v22 = vmul.f32 %v3403_v18, %v3403_v18 }
 0x87e   :  { %v1403_v14 = vsel %vm713_vm2, %v1399_v22, 0.0  ;;  %v2208_v22 = vld [vmem:[%s3743_s12 + $0x80] sm:$0xff] }
 0x87f   :  { %1404 = vadd.xlane.f32.xlu1 %v1403_v14 }
 0x8fc   :  { %v1414_v9 = vpop.xlane.xlu1 %1413 }
 0x8fd   :  { %2612 = vrsqrt.f32 %v1414_v9  ;;  %vm1438_vm7 = vcmp.eq.f32.partialorder %v1414_v9, inf  ;;  %v1441_v26 = vand.u32 2147483648, %v1414_v9  ;;  %vm1440_vm8 = vcmp.eq.f32.partialorder %v1414_v9, 0.0 }
 0x900   :  { %v1411_v10 = vpop.xlane.xlu0 %1410 }
 0x901   :  { %2614 = vrsqrt.f32 %v1411_v10  ;;  %vm1431_vm9 = vcmp.eq.f32.partialorder %v1411_v10, inf  ;;  %v1434_v33 = vand.u32 2147483648, %v1411_v10  ;;  %vm1433_vm10 = vcmp.eq.f32.partialorder %v1411_v10, 0.0 }
 0x904   :  { %v1408_v19 = vpop.xlane.xlu0 %1407 }
 0x905   :  { %2616 = vrsqrt.f32 %v1408_v19  ;;  %vm1424_vm11 = vcmp.eq.f32.partialorder %v1408_v19, inf  ;;  %v1427_v43 = vand.u32 2147483648, %v1408_v19  ;;  %vm1426_vm12 = vcmp.eq.f32.partialorder %v1408_v19, 0.0 }
 0x908   :  { %v1405_v23 = vpop.xlane.xlu1 %1404 }
 0x909   :  { %2618 = vrsqrt.f32 %v1405_v23  ;;  %vm1417_vm13 = vcmp.eq.f32.partialorder %v1405_v23, inf  ;;  %v1420_v38 = vand.u32 2147483648, %v1405_v23  ;;  %vm1419_vm14 = vcmp.eq.f32.partialorder %v1405_v23, 0.0 }
 0x90a   :  { %v2613_v24 = vpop.eup %2612 }
 0x90b   :  { %v1437_v25 = vmul.f32 %v2613_v24, %v1414_v9 }
 0x90d   :  { %v1439_v28 = vsel %vm1438_vm7, %v1414_v9, %v1437_v25 }
 0x90e   :  { %v2615_v29 = vpop.eup %2614  ;;  %v1442_v30 = vsel %vm1440_vm8, %v1441_v26, %v1439_v28 }
 0x90f   :  { %v1430_v31 = vmul.f32 %v2615_v29, %v1411_v10  ;;  %v1446_v32 = vadd.f32 %v2207_v27, %v1442_v30 }
 0x911   :  { %v1432_v35 = vsel %vm1431_vm9, %v1411_v10, %v1430_v31  ;;  %2620 = vrcp.f32 %v1446_v32 }
 0x912   :  { %v2617_v36 = vpop.eup %2616  ;;  %v1435_v40 = vsel %vm1433_vm10, %v1434_v33, %v1432_v35 }
 0x913   :  { %v1423_v41 = vmul.f32 %v2617_v36, %v1408_v19  ;;  %v1445_v42 = vadd.f32 %v2206_v34, %v1435_v40 }
 0x915   :  { %v1425_v49 = vsel %vm1424_vm11, %v1408_v19, %v1423_v41  ;;  %2622 = vrcp.f32 %v1445_v42 }
 0x916   :  { %v2619_v44 = vpop.eup %2618  ;;  %v1428_v51 = vsel %vm1426_vm12, %v1427_v43, %v1425_v49 }
 0x917   :  { %v1416_v37 = vmul.f32 %v2619_v44, %v1405_v23  ;;  %v1444_v53 = vadd.f32 %v2205_v46, %v1428_v51 }
 0x919   :  { %v1418_v60 = vsel %vm1417_vm13, %v1405_v23, %v1416_v37  ;;  %2624 = vrcp.f32 %v1444_v53 }
 0x91a   :  { %v1421_v45 = vsel %vm1419_vm14, %v1420_v38, %v1418_v60 }
 0x91b   :  { %v1443_v63 = vadd.f32 %v2204_v57, %v1421_v45 }
 0x91d   :  { %2626 = vrcp.f32 %v1443_v63 }
 0x91e   :  { %v2621_v55 = vpop.eup %2620 }
 0x91f   :  { %v1458_v62 = vmul.f32 %v2621_v55, %v2211_v48  ;;  %v1482_v58 = vmul.f32 %v2621_v55, %v2207_v27 }
 0x921   :  { %1520 = vperm.xlu0 %2480, %v1458_v62   ;;  %v1462_v61 = vadd.f32 1.0, %v1458_v62  ;;  %v1486_v2 = vmul.f32 %v1482_v58, %v1458_v62 }
 0x922   :  { %v2623_v13 = vpop.eup %2622 }
 0x923   :  { %2628 = vlog2.f32 %v1462_v61  ;;  %v1490_v52 = vadd.f32 1.0, %v1486_v2  ;;  %v1457_v0 = vmul.f32 %v2623_v13, %v2210_v1  ;;  %v1481_v11 = vmul.f32 %v2623_v13, %v2206_v34  ;;  %v2227_v1 = vld [vmem:[%s3741_s10 + $0xb8] sm:$0xff] }
 0x925   :  { %2630 = vlog2.f32 %v1490_v52  ;;  %1515 = vperm.xlu1 %2481, %v1457_v0   ;;  %v1461_v7 = vadd.f32 1.0, %v1457_v0  ;;  %v1485_v8 = vmul.f32 %v1481_v11, %v1457_v0 }
 0x926   :  { %v2625_v12 = vpop.eup %2624 }
 0x927   :  { %2632 = vlog2.f32 %v1461_v7  ;;  %v1489_v5 = vadd.f32 1.0, %v1485_v8  ;;  %v1456_v6 = vmul.f32 %v2625_v12, %v2209_v59  ;;  %v1480_v21 = vmul.f32 %v2625_v12, %v2205_v46  ;;  %v2225_v59 = vld [vmem:[%s3741_s10 + $0xa8] sm:$0xff] }
 0x929   :  { %2634 = vlog2.f32 %v1489_v5  ;;  %1510 = vperm.xlu1 %2481, %v1456_v6   ;;  %v1460_v14 = vadd.f32 1.0, %v1456_v6  ;;  %v1484_v9 = vmul.f32 %v1480_v21, %v1456_v6  ;;  %v2224_v6 = vld [vmem:[%s3741_s10 + $0xa0] sm:$0xff] }
 0x92a   :  { %v2627_v10 = vpop.eup %2626 }
 0x92b   :  { %2636 = vlog2.f32 %v1460_v14  ;;  %v1488_v19 = vadd.f32 1.0, %v1484_v9  ;;  %v1455_v23 = vmul.f32 %v2627_v10, %v2208_v22  ;;  %v1479_v24 = vmul.f32 %v2627_v10, %v2204_v57 }
 0x92d   :  { %2638 = vlog2.f32 %v1488_v19  ;;  %1505 = vperm.xlu0 %2480, %v1455_v23   ;;  %v1459_v25 = vadd.f32 1.0, %v1455_v23  ;;  %v1483_v26 = vmul.f32 %v1479_v24, %v1455_v23 }
 0x92f   :  { %2640 = vlog2.f32 %v1459_v25  ;;  %v1487_v27 = vadd.f32 1.0, %v1483_v26 }
 0x930   :  { %v2629_v28 = vpop.eup %2628 }
 0x931   :  { %v1470_v29 = vmul.f32 0.6931472, %v2629_v28  ;;  %2642 = vlog2.f32 %v1487_v27  ;;  %v2219_v27 = vld [vmem:[%s3742_s11 + $0xb8] sm:$0xff] }
 0x932   :  { %v2631_v30 = vpop.eup %2630 }
 0x933   :  { %v1474_v31 = vmul.f32 15.0, %v1470_v29  ;;  %v1498_v34 = vmul.f32 0.6931472, %v2631_v30 }
 0x934   :  { %v2633_v32 = vpop.eup %2632 }
 0x935   :  { %v1478_v33 = vadd.f32 %v1474_v31, %v3345_v39  ;;  %v1468_v35 = vmul.f32 0.6931472, %v2633_v32 }
 0x936   :  { %v2635_v36 = vpop.eup %2634 }
 0x937   :  { %v3433_v40 = vadd.f32 %v1498_v34, %v1478_v33  ;;  %v1473_v41 = vmul.f32 15.0, %v1468_v35  ;;  %v1496_v46 = vmul.f32 0.6931472, %v2635_v36  ;;  %v2218_v34 = vld [vmem:[%s3742_s11 + $0xb0] sm:$0xff] }
 0x938   :  { %v2637_v42 = vpop.eup %2636 }
 0x939   :  { %v1477_v43 = vadd.f32 %v1473_v41, %v3348_v50  ;;  %v1466_v49 = vmul.f32 0.6931472, %v2637_v42 }
 0x93a   :  { %v2639_v44 = vpop.eup %2638 }
 0x93b   :  { %v3436_v51 = vadd.f32 %v1496_v46, %v1477_v43  ;;  %v1472_v37 = vmul.f32 15.0, %v1466_v49  ;;  %v1494_v57 = vmul.f32 0.6931472, %v2639_v44  ;;  %v2217_v49 = vld [vmem:[%s3742_s11 + $0xa8] sm:$0xff] }
 0x93c   :  { %v2641_v53 = vpop.eup %2640 }
 0x93d   :  { %v1476_v38 = vadd.f32 %v1472_v37, %v3351_v54  ;;  %v1464_v39 = vmul.f32 0.6931472, %v2641_v53 }
 0x93e   :  { %v2643_v60 = vpop.eup %2642 }
 0x93f   :  { %v3439_v45 = vadd.f32 %v1494_v57, %v1476_v38  ;;  %v1471_v63 = vmul.f32 15.0, %v1464_v39  ;;  %v1492_v55 = vmul.f32 0.6931472, %v2643_v60  ;;  %v2216_v60 = vld [vmem:[%s3742_s11 + $0xa0] sm:$0xff] }
 0x941   :  { %v1475_v48 = vadd.f32 %v1471_v63, %v3354_v15  ;;  %v2226_v15 = vld [vmem:[%s3741_s10 + $0xb0] sm:$0xff] }
 0x943   :  { %v3442_v62 = vadd.f32 %v1492_v55, %v1475_v48 }
 0x99c   :  { %v1521_v50 = vpop.permute.xlu0 %1520 }
 0x99d   :  { %v1526_v58 = vmul.f32 %v1521_v50, %v3365_v3  ;;  %v2223_v50 = vld [vmem:[%s3743_s12 + $0xb8] sm:$0xff] }
 0x99f   :  { %v3449_v54 = vadd.f32 %v1526_v58, %v3361_v56 }
 0x9a0   :  { %v1516_v61 = vpop.permute.xlu1 %1515 }
 0x9a1   :  { %v1525_v2 = vmul.f32 %v1516_v61, %v3378_v17  ;;  %v3453_v13 = vsub.f32 %v3449_v54, %v2227_v1 }
 0x9a3   :  { %v3459_v52 = vadd.f32 %v1525_v2, %v3371_v47  ;;  %v1553_v3 = vmul.f32 %v3453_v13, %v3453_v13  ;;  %v2222_v2 = vld [vmem:[%s3743_s12 + $0xb0] sm:$0xff] }
 0x9a4   :  { %v1511_v0 = vpop.permute.xlu1 %1510 }
 0x9a5   :  { %v1524_v56 = vmul.f32 %v1511_v0, %v3391_v4  ;;  %v1563_v11 = vsel %vm713_vm2, %v1553_v3, 0.0  ;;  %v3466_v17 = vsub.f32 %v3459_v52, %v2226_v15 }
 0x9a6   :  { %1564 = vadd.xlane.f32.xlu1 %v1563_v11 }
 0x9a7   :  { %v3472_v7 = vadd.f32 %v1524_v56, %v3384_v16  ;;  %v1552_v47 = vmul.f32 %v3466_v17, %v3466_v17 }
 0x9a8   :  { %v1506_v8 = vpop.permute.xlu0 %1505 }
 0x9a9   :  { %v1523_v12 = vmul.f32 %v1506_v8, %v3403_v18  ;;  %v1560_v4 = vsel %vm713_vm2, %v1552_v47, 0.0  ;;  %v3479_v5 = vsub.f32 %v3472_v7, %v2225_v59  ;;  %v2221_v47 = vld [vmem:[%s3743_s12 + $0xa8] sm:$0xff] }
 0x9aa   :  { %1561 = vadd.xlane.f32.xlu0 %v1560_v4 }
 0x9ab   :  { %v3485_v21 = vadd.f32 %v1523_v12, %v3397_v20  ;;  %v1551_v16 = vmul.f32 %v3479_v5, %v3479_v5 }
 0x9ad   :  { %v1557_v22 = vsel %vm713_vm2, %v1551_v16, 0.0  ;;  %v3491_v18 = vsub.f32 %v3485_v21, %v2224_v6 }
 0x9ae   :  { %1558 = vadd.xlane.f32.xlu0 %v1557_v22 }
 0x9af   :  { %v1550_v14 = vmul.f32 %v3491_v18, %v3491_v18 }
 0x9b1   :  { %v1554_v9 = vsel %vm713_vm2, %v1550_v14, 0.0  ;;  %v2220_v14 = vld [vmem:[%s3743_s12 + $0xa0] sm:$0xff] }
 0x9b2   :  { %1555 = vadd.xlane.f32.xlu1 %v1554_v9 }
 0xa2f   :  { %v1565_v10 = vpop.xlane.xlu1 %1564 }
 0xa30   :  { %2644 = vrsqrt.f32 %v1565_v10  ;;  %vm1589_vm15 = vcmp.eq.f32.partialorder %v1565_v10, inf  ;;  %v1592_v26 = vand.u32 2147483648, %v1565_v10  ;;  %vm1591_vm1 = vcmp.eq.f32.partialorder %v1565_v10, 0.0 }
 0xa33   :  { %v1562_v19 = vpop.xlane.xlu0 %1561 }
 0xa34   :  { %2646 = vrsqrt.f32 %v1562_v19  ;;  %vm1582_vm3 = vcmp.eq.f32.partialorder %v1562_v19, inf  ;;  %v1585_v33 = vand.u32 2147483648, %v1562_v19  ;;  %vm1584_vm4 = vcmp.eq.f32.partialorder %v1562_v19, 0.0 }
 0xa37   :  { %v1559_v20 = vpop.xlane.xlu0 %1558 }
 0xa38   :  { %2648 = vrsqrt.f32 %v1559_v20  ;;  %vm1575_vm5 = vcmp.eq.f32.partialorder %v1559_v20, inf  ;;  %v1578_v46 = vand.u32 2147483648, %v1559_v20  ;;  %vm1577_vm6 = vcmp.eq.f32.partialorder %v1559_v20, 0.0 }
 0xa3b   :  { %v1556_v23 = vpop.xlane.xlu1 %1555 }
 0xa3c   :  { %2650 = vrsqrt.f32 %v1556_v23  ;;  %vm1568_vm7 = vcmp.eq.f32.partialorder %v1556_v23, inf  ;;  %v1571_v39 = vand.u32 2147483648, %v1556_v23  ;;  %vm1570_vm8 = vcmp.eq.f32.partialorder %v1556_v23, 0.0 }
 0xa3d   :  { %v2645_v24 = vpop.eup %2644 }
 0xa3e   :  { %v1588_v25 = vmul.f32 %v2645_v24, %v1565_v10 }
 0xa40   :  { %v1590_v28 = vsel %vm1589_vm15, %v1565_v10, %v1588_v25 }
 0xa41   :  { %v2647_v29 = vpop.eup %2646  ;;  %v1593_v30 = vsel %vm1591_vm1, %v1592_v26, %v1590_v28 }
 0xa42   :  { %v1581_v31 = vmul.f32 %v2647_v29, %v1562_v19  ;;  %v1597_v32 = vadd.f32 %v2219_v27, %v1593_v30 }
 0xa44   :  { %v1583_v35 = vsel %vm1582_vm3, %v1562_v19, %v1581_v31  ;;  %2652 = vrcp.f32 %v1597_v32 }
 0xa45   :  { %v2649_v36 = vpop.eup %2648  ;;  %v1586_v41 = vsel %vm1584_vm4, %v1585_v33, %v1583_v35 }
 0xa46   :  { %v1574_v42 = vmul.f32 %v2649_v36, %v1559_v20  ;;  %v1596_v43 = vadd.f32 %v2218_v34, %v1586_v41 }
 0xa48   :  { %v1576_v44 = vsel %vm1575_vm5, %v1559_v20, %v1574_v42  ;;  %2654 = vrcp.f32 %v1596_v43 }
 0xa49   :  { %v2651_v37 = vpop.eup %2650  ;;  %v1579_v53 = vsel %vm1577_vm6, %v1578_v46, %v1576_v44 }
 0xa4a   :  { %v1567_v38 = vmul.f32 %v2651_v37, %v1556_v23  ;;  %v1595_v57 = vadd.f32 %v2217_v49, %v1579_v53 }
 0xa4c   :  { %v1569_v63 = vsel %vm1568_vm7, %v1556_v23, %v1567_v38  ;;  %2656 = vrcp.f32 %v1595_v57 }
 0xa4d   :  { %v1572_v48 = vsel %vm1570_vm8, %v1571_v39, %v1569_v63 }
 0xa4e   :  { %v1594_v55 = vadd.f32 %v2216_v60, %v1572_v48 }
 0xa50   :  { %2658 = vrcp.f32 %v1594_v55 }
 0xa51   :  { %v2653_v58 = vpop.eup %2652 }
 0xa52   :  { %v1609_v1 = vmul.f32 %v2653_v58, %v2223_v50  ;;  %v1633_v61 = vmul.f32 %v2653_v58, %v2219_v27 }
 0xa54   :  { %1671 = vperm.xlu0 %2480, %v1609_v1   ;;  %v1613_v15 = vadd.f32 1.0, %v1609_v1  ;;  %v1637_v3 = vmul.f32 %v1633_v61, %v1609_v1 }
 0xa55   :  { %v2655_v0 = vpop.eup %2654 }
 0xa56   :  { %2660 = vlog2.f32 %v1613_v15  ;;  %v1641_v56 = vadd.f32 1.0, %v1637_v3  ;;  %v1608_v11 = vmul.f32 %v2655_v0, %v2222_v2  ;;  %v1632_v59 = vmul.f32 %v2655_v0, %v2218_v34  ;;  %v2239_v2 = vld [vmem:[%s3741_s10 + $0xd8] sm:$0xff] }
 0xa58   :  { %2662 = vlog2.f32 %v1641_v56  ;;  %1666 = vperm.xlu1 %2481, %v1608_v11   ;;  %v1612_v8 = vadd.f32 1.0, %v1608_v11  ;;  %v1636_v12 = vmul.f32 %v1632_v59, %v1608_v11 }
 0xa59   :  { %v2657_v4 = vpop.eup %2656 }
 0xa5a   :  { %2664 = vlog2.f32 %v1612_v8  ;;  %v1640_v6 = vadd.f32 1.0, %v1636_v12  ;;  %v1607_v16 = vmul.f32 %v2657_v4, %v2221_v47  ;;  %v1631_v22 = vmul.f32 %v2657_v4, %v2217_v49  ;;  %v2237_v47 = vld [vmem:[%s3741_s10 + $0xc8] sm:$0xff] }
 0xa5c   :  { %2666 = vlog2.f32 %v1640_v6  ;;  %1661 = vperm.xlu1 %2481, %v1607_v16   ;;  %v1611_v9 = vadd.f32 1.0, %v1607_v16  ;;  %v1635_v10 = vmul.f32 %v1631_v22, %v1607_v16  ;;  %v2236_v16 = vld [vmem:[%s3741_s10 + $0xc0] sm:$0xff] }
 0xa5d   :  { %v2659_v19 = vpop.eup %2658 }
 0xa5e   :  { %2668 = vlog2.f32 %v1611_v9  ;;  %v1639_v20 = vadd.f32 1.0, %v1635_v10  ;;  %v1606_v23 = vmul.f32 %v2659_v19, %v2220_v14  ;;  %v1630_v24 = vmul.f32 %v2659_v19, %v2216_v60 }
 0xa60   :  { %2670 = vlog2.f32 %v1639_v20  ;;  %1656 = vperm.xlu0 %2480, %v1606_v23   ;;  %v1610_v25 = vadd.f32 1.0, %v1606_v23  ;;  %v1634_v26 = vmul.f32 %v1630_v24, %v1606_v23 }
 0xa62   :  { %2672 = vlog2.f32 %v1610_v25  ;;  %v1638_v27 = vadd.f32 1.0, %v1634_v26 }
 0xa63   :  { %v2661_v28 = vpop.eup %2660 }
 0xa64   :  { %v1621_v29 = vmul.f32 0.6931472, %v2661_v28  ;;  %2674 = vlog2.f32 %v1638_v27  ;;  %v2231_v27 = vld [vmem:[%s3742_s11 + $0xd8] sm:$0xff] }
 0xa65   :  { %v2663_v30 = vpop.eup %2662 }
 0xa66   :  { %v1625_v31 = vmul.f32 15.0, %v1621_v29  ;;  %v1649_v33 = vmul.f32 0.6931472, %v2663_v30 }
 0xa67   :  { %v2665_v32 = vpop.eup %2664 }
 0xa68   :  { %v1619_v34 = vmul.f32 0.6931472, %v2665_v32  ;;  %v1629_v35 = vadd.f32 %v1625_v31, %v3433_v40 }
 0xa69   :  { %v2667_v36 = vpop.eup %2666 }
 0xa6a   :  { %v1624_v41 = vmul.f32 15.0, %v1619_v34  ;;  %v3521_v42 = vadd.f32 %v1649_v33, %v1629_v35  ;;  %v1647_v46 = vmul.f32 0.6931472, %v2667_v36  ;;  %v2230_v34 = vld [vmem:[%s3742_s11 + $0xd0] sm:$0xff] }
 0xa6b   :  { %v2669_v43 = vpop.eup %2668 }
 0xa6c   :  { %v1617_v49 = vmul.f32 0.6931472, %v2669_v43  ;;  %v1628_v44 = vadd.f32 %v1624_v41, %v3436_v51 }
 0xa6d   :  { %v2671_v37 = vpop.eup %2670 }
 0xa6e   :  { %v1623_v53 = vmul.f32 15.0, %v1617_v49  ;;  %v3524_v38 = vadd.f32 %v1647_v46, %v1628_v44  ;;  %v1645_v39 = vmul.f32 0.6931472, %v2671_v37  ;;  %v2229_v44 = vld [vmem:[%s3742_s11 + $0xc8] sm:$0xff] }
 0xa6f   :  { %v2673_v57 = vpop.eup %2672 }
 0xa70   :  { %v1615_v60 = vmul.f32 0.6931472, %v2673_v57  ;;  %v1627_v63 = vadd.f32 %v1623_v53, %v3439_v45 }
 0xa71   :  { %v2675_v48 = vpop.eup %2674 }
 0xa72   :  { %v1622_v40 = vmul.f32 15.0, %v1615_v60  ;;  %v3527_v55 = vadd.f32 %v1645_v39, %v1627_v63  ;;  %v1643_v50 = vmul.f32 0.6931472, %v2675_v48  ;;  %v2228_v48 = vld [vmem:[%s3742_s11 + $0xc0] sm:$0xff] }
 0xa74   :  { %v1626_v58 = vadd.f32 %v1622_v40, %v3442_v62  ;;  %v2238_v62 = vld [vmem:[%s3741_s10 + $0xd0] sm:$0xff] }
 0xa76   :  { %v3530_v1 = vadd.f32 %v1643_v50, %v1626_v58 }
 0xacf   :  { %v1672_v61 = vpop.permute.xlu0 %1671 }
 0xad0   :  { %v1677_v51 = vmul.f32 %v1672_v61, %v3453_v13  ;;  %v2235_v61 = vld [vmem:[%s3743_s12 + $0xd8] sm:$0xff] }
 0xad2   :  { %v3537_v15 = vadd.f32 %v1677_v51, %v3449_v54 }
 0xad3   :  { %v1667_v45 = vpop.permute.xlu1 %1666 }
 0xad4   :  { %v1676_v3 = vmul.f32 %v1667_v45, %v3466_v17  ;;  %v3541_v0 = vsub.f32 %v3537_v15, %v2239_v2 }
 0xad6   :  { %v3547_v56 = vadd.f32 %v1676_v3, %v3459_v52  ;;  %v1704_v13 = vmul.f32 %v3541_v0, %v3541_v0  ;;  %v2234_v3 = vld [vmem:[%s3743_s12 + $0xd0] sm:$0xff] }
 0xad7   :  { %v1662_v11 = vpop.permute.xlu1 %1661 }
 0xad8   :  { %v1675_v54 = vmul.f32 %v1662_v11, %v3479_v5  ;;  %v1714_v59 = vsel %vm713_vm2, %v1704_v13, 0.0  ;;  %v3554_v17 = vsub.f32 %v3547_v56, %v2238_v62 }
 0xad9   :  { %1715 = vadd.xlane.f32.xlu1 %v1714_v59 }
 0xada   :  { %v3560_v8 = vadd.f32 %v1675_v54, %v3472_v7  ;;  %v1703_v52 = vmul.f32 %v3554_v17, %v3554_v17 }
 0xadb   :  { %v1657_v12 = vpop.permute.xlu0 %1656 }
 0xadc   :  { %v1674_v4 = vmul.f32 %v1657_v12, %v3491_v18  ;;  %v1711_v5 = vsel %vm713_vm2, %v1703_v52, 0.0  ;;  %v3567_v6 = vsub.f32 %v3560_v8, %v2237_v47  ;;  %v2233_v52 = vld [vmem:[%s3743_s12 + $0xc8] sm:$0xff] }
 0xadd   :  { %1712 = vadd.xlane.f32.xlu0 %v1711_v5 }
 0xade   :  { %v3573_v22 = vadd.f32 %v1674_v4, %v3485_v21  ;;  %v1702_v7 = vmul.f32 %v3567_v6, %v3567_v6 }
 0xae0   :  { %v1708_v14 = vsel %vm713_vm2, %v1702_v7, 0.0  ;;  %v3579_v18 = vsub.f32 %v3573_v22, %v2236_v16 }
 0xae1   :  { %1709 = vadd.xlane.f32.xlu0 %v1708_v14 }
 0xae2   :  { %v1701_v9 = vmul.f32 %v3579_v18, %v3579_v18 }
 0xae4   :  { %v1705_v10 = vsel %vm713_vm2, %v1701_v9, 0.0  ;;  %v2232_v9 = vld [vmem:[%s3743_s12 + $0xc0] sm:$0xff] }
 0xae5   :  { %1706 = vadd.xlane.f32.xlu1 %v1705_v10 }
 0xb62   :  { %v1716_v19 = vpop.xlane.xlu1 %1715 }
 0xb63   :  { %2676 = vrsqrt.f32 %v1716_v19  ;;  %vm1740_vm9 = vcmp.eq.f32.partialorder %v1716_v19, inf  ;;  %v1743_v26 = vand.u32 2147483648, %v1716_v19  ;;  %vm1742_vm10 = vcmp.eq.f32.partialorder %v1716_v19, 0.0 }
 0xb66   :  { %v1713_v20 = vpop.xlane.xlu0 %1712 }
 0xb67   :  { %2678 = vrsqrt.f32 %v1713_v20  ;;  %vm1733_vm11 = vcmp.eq.f32.partialorder %v1713_v20, inf  ;;  %v1736_v33 = vand.u32 2147483648, %v1713_v20  ;;  %vm1735_vm12 = vcmp.eq.f32.partialorder %v1713_v20, 0.0 }
 0xb6a   :  { %v1710_v21 = vpop.xlane.xlu0 %1709 }
 0xb6b   :  { %2680 = vrsqrt.f32 %v1710_v21  ;;  %vm1726_vm13 = vcmp.eq.f32.partialorder %v1710_v21, inf  ;;  %v1729_v49 = vand.u32 2147483648, %v1710_v21  ;;  %vm1728_vm14 = vcmp.eq.f32.partialorder %v1710_v21, 0.0 }
 0xb6e   :  { %v1707_v23 = vpop.xlane.xlu1 %1706 }
 0xb6f   :  { %2682 = vrsqrt.f32 %v1707_v23  ;;  %vm1719_vm15 = vcmp.eq.f32.partialorder %v1707_v23, inf  ;;  %v1722_v63 = vand.u32 2147483648, %v1707_v23  ;;  %vm1721_vm1 = vcmp.eq.f32.partialorder %v1707_v23, 0.0 }
 0xb70   :  { %v2677_v24 = vpop.eup %2676 }
 0xb71   :  { %v1739_v25 = vmul.f32 %v2677_v24, %v1716_v19 }
 0xb73   :  { %v1741_v28 = vsel %vm1740_vm9, %v1716_v19, %v1739_v25 }
 0xb74   :  { %v2679_v29 = vpop.eup %2678  ;;  %v1744_v30 = vsel %vm1742_vm10, %v1743_v26, %v1741_v28 }
 0xb75   :  { %v1732_v31 = vmul.f32 %v2679_v29, %v1713_v20  ;;  %v1748_v32 = vadd.f32 %v2231_v27, %v1744_v30 }
 0xb77   :  { %v1734_v35 = vsel %vm1733_vm11, %v1713_v20, %v1732_v31  ;;  %2684 = vrcp.f32 %v1748_v32 }
 0xb78   :  { %v2681_v36 = vpop.eup %2680  ;;  %v1737_v41 = vsel %vm1735_vm12, %v1736_v33, %v1734_v35 }
 0xb79   :  { %v1725_v43 = vmul.f32 %v2681_v36, %v1710_v21  ;;  %v1747_v46 = vadd.f32 %v2230_v34, %v1737_v41 }
 0xb7b   :  { %v1727_v37 = vsel %vm1726_vm13, %v1710_v21, %v1725_v43  ;;  %2686 = vrcp.f32 %v1747_v46 }
 0xb7c   :  { %v2683_v53 = vpop.eup %2682  ;;  %v1730_v57 = vsel %vm1728_vm14, %v1729_v49, %v1727_v37 }
 0xb7d   :  { %v1718_v39 = vmul.f32 %v2683_v53, %v1707_v23  ;;  %v1746_v60 = vadd.f32 %v2229_v44, %v1730_v57 }
 0xb7f   :  { %v1720_v40 = vsel %vm1719_vm15, %v1707_v23, %v1718_v39  ;;  %2688 = vrcp.f32 %v1746_v60 }
 0xb80   :  { %v1723_v50 = vsel %vm1721_vm1, %v1722_v63, %v1720_v40 }
 0xb81   :  { %v1745_v58 = vadd.f32 %v2228_v48, %v1723_v50 }
 0xb83   :  { %2690 = vrcp.f32 %v1745_v58 }
 0xb84   :  { %v2685_v51 = vpop.eup %2684 }
 0xb85   :  { %v1760_v2 = vmul.f32 %v2685_v51, %v2235_v61  ;;  %v1784_v45 = vmul.f32 %v2685_v51, %v2231_v27 }
 0xb87   :  { %1822 = vperm.xlu0 %2480, %v1760_v2   ;;  %v1764_v62 = vadd.f32 1.0, %v1760_v2  ;;  %v1788_v13 = vmul.f32 %v1784_v45, %v1760_v2 }
 0xb88   :  { %v2687_v11 = vpop.eup %2686 }
 0xb89   :  { %2692 = vlog2.f32 %v1764_v62  ;;  %v1792_v54 = vadd.f32 1.0, %v1788_v13  ;;  %v1759_v59 = vmul.f32 %v2687_v11, %v2234_v3  ;;  %v1783_v47 = vmul.f32 %v2687_v11, %v2230_v34  ;;  %v2251_v3 = vld [vmem:[%s3741_s10 + $0xf8] sm:$0xff] }
 0xb8b   :  { %2694 = vlog2.f32 %v1792_v54  ;;  %1817 = vperm.xlu1 %2481, %v1759_v59   ;;  %v1763_v12 = vadd.f32 1.0, %v1759_v59  ;;  %v1787_v4 = vmul.f32 %v1783_v47, %v1759_v59 }
 0xb8c   :  { %v2689_v5 = vpop.eup %2688 }
 0xb8d   :  { %2696 = vlog2.f32 %v1763_v12  ;;  %v1791_v16 = vadd.f32 1.0, %v1787_v4  ;;  %v1758_v7 = vmul.f32 %v2689_v5, %v2233_v52  ;;  %v1782_v14 = vmul.f32 %v2689_v5, %v2229_v44  ;;  %v2249_v52 = vld [vmem:[%s3741_s10 + $0xe8] sm:$0xff] }
 0xb8f   :  { %2698 = vlog2.f32 %v1791_v16  ;;  %1812 = vperm.xlu1 %2481, %v1758_v7   ;;  %v1762_v10 = vadd.f32 1.0, %v1758_v7  ;;  %v1786_v19 = vmul.f32 %v1782_v14, %v1758_v7  ;;  %v2248_v7 = vld [vmem:[%s3741_s10 + $0xe0] sm:$0xff] }
 0xb90   :  { %v2691_v20 = vpop.eup %2690 }
 0xb91   :  { %2700 = vlog2.f32 %v1762_v10  ;;  %v1790_v21 = vadd.f32 1.0, %v1786_v19  ;;  %v1757_v23 = vmul.f32 %v2691_v20, %v2232_v9  ;;  %v1781_v24 = vmul.f32 %v2691_v20, %v2228_v48 }
 0xb93   :  { %2702 = vlog2.f32 %v1790_v21  ;;  %1807 = vperm.xlu0 %2480, %v1757_v23   ;;  %v1761_v25 = vadd.f32 1.0, %v1757_v23  ;;  %v1785_v26 = vmul.f32 %v1781_v24, %v1757_v23 }
 0xb95   :  { %2704 = vlog2.f32 %v1761_v25  ;;  %v1789_v27 = vadd.f32 1.0, %v1785_v26 }
 0xb96   :  { %v2693_v28 = vpop.eup %2692 }
 0xb97   :  { %v1772_v29 = vmul.f32 0.6931472, %v2693_v28  ;;  %2706 = vlog2.f32 %v1789_v27  ;;  %v2243_v27 = vld [vmem:[%s3742_s11 + $0xf8] sm:$0xff] }
 0xb98   :  { %v2695_v30 = vpop.eup %2694 }
 0xb99   :  { %v1776_v31 = vmul.f32 15.0, %v1772_v29  ;;  %v1800_v35 = vmul.f32 0.6931472, %v2695_v30 }
 0xb9a   :  { %v2697_v32 = vpop.eup %2696 }
 0xb9b   :  { %v1770_v33 = vmul.f32 0.6931472, %v2697_v32  ;;  %v1780_v34 = vadd.f32 %v1776_v31, %v3521_v42 }
 0xb9c   :  { %v2699_v36 = vpop.eup %2698 }
 0xb9d   :  { %v3609_v41 = vadd.f32 %v1800_v35, %v1780_v34  ;;  %v1775_v43 = vmul.f32 15.0, %v1770_v33  ;;  %v1798_v37 = vmul.f32 0.6931472, %v2699_v36  ;;  %v2242_v34 = vld [vmem:[%s3742_s11 + $0xf0] sm:$0xff] }
 0xb9e   :  { %v2701_v46 = vpop.eup %2700 }
 0xb9f   :  { %v1768_v49 = vmul.f32 0.6931472, %v2701_v46  ;;  %v1779_v44 = vadd.f32 %v1775_v43, %v3524_v38 }
 0xba0   :  { %v2703_v53 = vpop.eup %2702 }
 0xba1   :  { %v3612_v57 = vadd.f32 %v1798_v37, %v1779_v44  ;;  %v1774_v39 = vmul.f32 15.0, %v1768_v49  ;;  %v1796_v40 = vmul.f32 0.6931472, %v2703_v53  ;;  %v2241_v37 = vld [vmem:[%s3742_s11 + $0xe8] sm:$0xff] }
 0xba2   :  { %v2705_v60 = vpop.eup %2704 }
 0xba3   :  { %v1766_v63 = vmul.f32 0.6931472, %v2705_v60  ;;  %v1778_v48 = vadd.f32 %v1774_v39, %v3527_v55 }
 0xba4   :  { %v2707_v42 = vpop.eup %2706 }
 0xba5   :  { %v3615_v50 = vadd.f32 %v1796_v40, %v1778_v48  ;;  %v1773_v58 = vmul.f32 15.0, %v1766_v63  ;;  %v1794_v51 = vmul.f32 0.6931472, %v2707_v42  ;;  %v2240_v42 = vld [vmem:[%s3742_s11 + $0xe0] sm:$0xff] }
 0xba7   :  { %v1777_v61 = vadd.f32 %v1773_v58, %v3530_v1  ;;  %v2250_v1 = vld [vmem:[%s3741_s10 + $0xf0] sm:$0xff] }
 0xba9   :  { %v3618_v2 = vadd.f32 %v1794_v51, %v1777_v61 }
 0xc02   :  { %v1823_v38 = vpop.permute.xlu0 %1822 }
 0xc03   :  { %v1828_v45 = vmul.f32 %v1823_v38, %v3541_v0  ;;  %v2247_v38 = vld [vmem:[%s3743_s12 + $0xf8] sm:$0xff] }
 0xc05   :  { %v3625_v62 = vadd.f32 %v1828_v45, %v3537_v15 }
 0xc06   :  { %v1818_v55 = vpop.permute.xlu1 %1817 }
 0xc07   :  { %v1827_v13 = vmul.f32 %v1818_v55, %v3554_v17  ;;  %v3629_v11 = vsub.f32 %v3625_v62, %v2251_v3 }
 0xc09   :  { %v3635_v54 = vadd.f32 %v1827_v13, %v3547_v56  ;;  %v1855_v0 = vmul.f32 %v3629_v11, %v3629_v11  ;;  %v2246_v13 = vld [vmem:[%s3743_s12 + $0xf0] sm:$0xff] }
 0xc0a   :  { %v1813_v59 = vpop.permute.xlu1 %1812 }
 0xc0b   :  { %v1826_v15 = vmul.f32 %v1813_v59, %v3567_v6  ;;  %v1865_v47 = vsel %vm713_vm2, %v1855_v0, 0.0  ;;  %v3642_v17 = vsub.f32 %v3635_v54, %v2250_v1 }
 0xc0c   :  { %1866 = vadd.xlane.f32.xlu1 %v1865_v47 }
 0xc0d   :  { %v3648_v12 = vadd.f32 %v1826_v15, %v3560_v8  ;;  %v1854_v56 = vmul.f32 %v3642_v17, %v3642_v17 }
 0xc0e   :  { %v1808_v4 = vpop.permute.xlu0 %1807 }
 0xc0f   :  { %v1825_v5 = vmul.f32 %v1808_v4, %v3579_v18  ;;  %v1862_v6 = vsel %vm713_vm2, %v1854_v56, 0.0  ;;  %v3655_v16 = vsub.f32 %v3648_v12, %v2249_v52  ;;  %v2245_v56 = vld [vmem:[%s3743_s12 + $0xe8] sm:$0xff] }
 0xc10   :  { %1863 = vadd.xlane.f32.xlu0 %v1862_v6 }
 0xc11   :  { %v3661_v14 = vadd.f32 %v1825_v5, %v3573_v22  ;;  %v1853_v8 = vmul.f32 %v3655_v16, %v3655_v16 }
 0xc13   :  { %v1859_v9 = vsel %vm713_vm2, %v1853_v8, 0.0  ;;  %v3667_v18 = vsub.f32 %v3661_v14, %v2248_v7 }
 0xc14   :  { %1860 = vadd.xlane.f32.xlu0 %v1859_v9 }
 0xc15   :  { %v1852_v10 = vmul.f32 %v3667_v18, %v3667_v18 }
 0xc17   :  { %v1856_v19 = vsel %vm713_vm2, %v1852_v10, 0.0  ;;  %v2244_v10 = vld [vmem:[%s3743_s12 + $0xe0] sm:$0xff] }
 0xc18   :  { %1857 = vadd.xlane.f32.xlu1 %v1856_v19 }
 0xc95   :  { %v1867_v20 = vpop.xlane.xlu1 %1866 }
 0xc96   :  { %2708 = vrsqrt.f32 %v1867_v20  ;;  %vm1891_vm3 = vcmp.eq.f32.partialorder %v1867_v20, inf  ;;  %v1894_v26 = vand.u32 2147483648, %v1867_v20  ;;  %vm1893_vm4 = vcmp.eq.f32.partialorder %v1867_v20, 0.0 }
 0xc99   :  { %v1864_v21 = vpop.xlane.xlu0 %1863 }
 0xc9a   :  { %2710 = vrsqrt.f32 %v1864_v21  ;;  %vm1884_vm5 = vcmp.eq.f32.partialorder %v1864_v21, inf  ;;  %v1887_v33 = vand.u32 2147483648, %v1864_v21  ;;  %vm1886_vm6 = vcmp.eq.f32.partialorder %v1864_v21, 0.0 }
 0xc9d   :  { %v1861_v22 = vpop.xlane.xlu0 %1860 }
 0xc9e   :  { %2712 = vrsqrt.f32 %v1861_v22  ;;  %vm1877_vm7 = vcmp.eq.f32.partialorder %v1861_v22, inf  ;;  %v1880_v44 = vand.u32 2147483648, %v1861_v22  ;;  %vm1879_vm8 = vcmp.eq.f32.partialorder %v1861_v22, 0.0 }
 0xca1   :  { %v1858_v23 = vpop.xlane.xlu1 %1857 }
 0xca2   :  { %2714 = vrsqrt.f32 %v1858_v23  ;;  %vm1870_vm9 = vcmp.eq.f32.partialorder %v1858_v23, inf  ;;  %v1873_v40 = vand.u32 2147483648, %v1858_v23  ;;  %vm1872_vm10 = vcmp.eq.f32.partialorder %v1858_v23, 0.0 }
 0xca3   :  { %v2709_v24 = vpop.eup %2708 }
 0xca4   :  { %v1890_v25 = vmul.f32 %v2709_v24, %v1867_v20 }
 0xca6   :  { %v1892_v28 = vsel %vm1891_vm3, %v1867_v20, %v1890_v25 }
 0xca7   :  { %v2711_v29 = vpop.eup %2710  ;;  %v1895_v30 = vsel %vm1893_vm4, %v1894_v26, %v1892_v28 }
 0xca8   :  { %v1883_v31 = vmul.f32 %v2711_v29, %v1864_v21  ;;  %v1899_v32 = vadd.f32 %v2243_v27, %v1895_v30 }
 0xcaa   :  { %v1885_v35 = vsel %vm1884_vm5, %v1864_v21, %v1883_v31  ;;  %2716 = vrcp.f32 %v1899_v32 }
 0xcab   :  { %v2713_v36 = vpop.eup %2712  ;;  %v1888_v43 = vsel %vm1886_vm6, %v1887_v33, %v1885_v35 }
 0xcac   :  { %v1876_v46 = vmul.f32 %v2713_v36, %v1861_v22  ;;  %v1898_v49 = vadd.f32 %v2242_v34, %v1888_v43 }
 0xcae   :  { %v1878_v53 = vsel %vm1877_vm7, %v1861_v22, %v1876_v46  ;;  %2718 = vrcp.f32 %v1898_v49 }
 0xcaf   :  { %v2715_v39 = vpop.eup %2714  ;;  %v1881_v60 = vsel %vm1879_vm8, %v1880_v44, %v1878_v53 }
 0xcb0   :  { %v1869_v63 = vmul.f32 %v2715_v39, %v1858_v23  ;;  %v1897_v48 = vadd.f32 %v2241_v37, %v1881_v60 }
 0xcb2   :  { %v1871_v58 = vsel %vm1870_vm9, %v1858_v23, %v1869_v63  ;;  %2720 = vrcp.f32 %v1897_v48 }
 0xcb3   :  { %v1874_v61 = vsel %vm1872_vm10, %v1873_v40, %v1871_v58 }
 0xcb4   :  { %v1896_v51 = vadd.f32 %v2240_v42, %v1874_v61 }
 0xcb6   :  { %2722 = vrcp.f32 %v1896_v51 }
 0xcb7   :  { %v2717_v45 = vpop.eup %2716 }
 0xcb8   :  { %v1911_v3 = vmul.f32 %v2717_v45, %v2247_v38  ;;  %v1935_v55 = vmul.f32 %v2717_v45, %v2243_v27 }
 0xcba   :  { %1973 = vperm.xlu0 %2480, %v1911_v3   ;;  %v1915_v1 = vadd.f32 1.0, %v1911_v3  ;;  %v1939_v0 = vmul.f32 %v1935_v55, %v1911_v3 }
 0xcbb   :  { %v2719_v59 = vpop.eup %2718 }
 0xcbc   :  { %2724 = vlog2.f32 %v1915_v1  ;;  %v1943_v15 = vadd.f32 1.0, %v1939_v0  ;;  %v1910_v47 = vmul.f32 %v2719_v59, %v2246_v13  ;;  %v1934_v52 = vmul.f32 %v2719_v59, %v2242_v34 }
 0xcbe   :  { %2726 = vlog2.f32 %v1943_v15  ;;  %1968 = vperm.xlu1 %2481, %v1910_v47   ;;  %v1914_v4 = vadd.f32 1.0, %v1910_v47  ;;  %v1938_v5 = vmul.f32 %v1934_v52, %v1910_v47 }
 0xcbf   :  { %v2721_v6 = vpop.eup %2720 }
 0xcc0   :  { %2728 = vlog2.f32 %v1914_v4  ;;  %v1942_v7 = vadd.f32 1.0, %v1938_v5  ;;  %v1909_v8 = vmul.f32 %v2721_v6, %v2245_v56  ;;  %v1933_v9 = vmul.f32 %v2721_v6, %v2241_v37 }
 0xcc2   :  { %2730 = vlog2.f32 %v1942_v7  ;;  %1963 = vperm.xlu1 %2481, %v1909_v8   ;;  %v1913_v19 = vadd.f32 1.0, %v1909_v8  ;;  %v1937_v20 = vmul.f32 %v1933_v9, %v1909_v8 }
 0xcc3   :  { %v2723_v21 = vpop.eup %2722 }
 0xcc4   :  { %2732 = vlog2.f32 %v1913_v19  ;;  %v1941_v22 = vadd.f32 1.0, %v1937_v20  ;;  %v1908_v23 = vmul.f32 %v2723_v21, %v2244_v10  ;;  %v1932_v24 = vmul.f32 %v2723_v21, %v2240_v42 }
 0xcc6   :  { %2734 = vlog2.f32 %v1941_v22  ;;  %1958 = vperm.xlu0 %2480, %v1908_v23   ;;  %v1912_v25 = vadd.f32 1.0, %v1908_v23  ;;  %v1936_v26 = vmul.f32 %v1932_v24, %v1908_v23 }
 0xcc8   :  { %2736 = vlog2.f32 %v1912_v25  ;;  %v1940_v27 = vadd.f32 1.0, %v1936_v26 }
 0xcc9   :  { %v2725_v28 = vpop.eup %2724 }
 0xcca   :  { %2738 = vlog2.f32 %v1940_v27  ;;  %v1923_v29 = vmul.f32 0.6931472, %v2725_v28 }
 0xccb   :  { %v2727_v30 = vpop.eup %2726 }
 0xccc   :  { %v1927_v31 = vmul.f32 15.0, %v1923_v29  ;;  %v1951_v34 = vmul.f32 0.6931472, %v2727_v30 }
 0xccd   :  { %v2729_v32 = vpop.eup %2728 }
 0xcce   :  { %v1931_v33 = vadd.f32 %v1927_v31, %v3609_v41  ;;  %v1921_v35 = vmul.f32 0.6931472, %v2729_v32  ;;  %v2749_v32 = vmov 0.0  }
 0xccf   :  { %v2731_v36 = vpop.eup %2730  ;;  %2466 = vmatprep.subr.mxu0 %v2749_v32 }
 0xcd0   :  { %v1955_v43 = vadd.f32 %v1951_v34, %v1931_v33  ;;  %v1926_v46 = vmul.f32 15.0, %v1921_v35  ;;  %v1949_v37 = vmul.f32 0.6931472, %v2731_v36 }
 0xcd1   :  { %v2733_v49 = vpop.eup %2732 }
 0xcd2   :  { %v1930_v44 = vadd.f32 %v1926_v46, %v3612_v57  ;;  %v1919_v53 = vmul.f32 0.6931472, %v2733_v49 }
 0xcd3   :  { %v2735_v39 = vpop.eup %2734 }
 0xcd4   :  { %v1954_v60 = vadd.f32 %v1949_v37, %v1930_v44  ;;  %v1925_v63 = vmul.f32 15.0, %v1919_v53  ;;  %v1947_v42 = vmul.f32 0.6931472, %v2735_v39  ;;  %v2022_v44 = vld [vmem:[%s3744_s13 + $0x10] sm:$0xff]  ;;  %v2021_v39 = vld [vmem:[%s3744_s13 + $0x8] sm:$0xff] }
 0xcd5   :  { %v2737_v48 = vpop.eup %2736 }
 0xcd6   :  { %v1929_v40 = vadd.f32 %v1925_v63, %v3615_v50  ;;  %v1917_v58 = vmul.f32 0.6931472, %v2737_v48  ;;  %v2020_v48 = vld [vmem:[%s3744_s13] sm:$0xff] }
 0xcd7   :  { %v2739_v61 = vpop.eup %2738 }
 0xcd8   :  { %v1953_v41 = vadd.f32 %v1947_v42, %v1929_v40  ;;  %v1924_v51 = vmul.f32 15.0, %v1917_v58  ;;  %v1945_v45 = vmul.f32 0.6931472, %v2739_v61  ;;  %v2048_v58 = vld [vmem:[%s3745_s14] sm:$0xff] }
 0xcda   :  { %v1928_v38 = vadd.f32 %v1924_v51, %v3618_v2 }
 0xcdc   :  { %v1952_v3 = vadd.f32 %v1945_v45, %v1928_v38 }
 0xd35   :  { %v1974_v55 = vpop.permute.xlu0 %1973 }
 0xd36   :  { %v1979_v57 = vmul.f32 %v1974_v55, %v3629_v11 }
 0xd38   :  { %v1983_v13 = vadd.f32 %v1979_v57, %v3625_v62 }
 0xd39   :  { %v1969_v1 = vpop.permute.xlu1 %1968 }
 0xd3a   :  { %v1978_v0 = vmul.f32 %v1969_v1, %v3642_v17  ;;  %v1987_v59 = vmul.f32 %v1983_v13, %v1983_v13 }
 0xd3c   :  { %v1982_v50 = vadd.f32 %v1978_v0, %v3635_v54  ;;  %v1997_v15 = vsel %vm713_vm2, %v1987_v59, 0.0 }
 0xd3d   :  { %1998 = vadd.xlane.f32.xlu1 %v1997_v15  ;;  %v1964_v47 = vpop.permute.xlu1 %1963 }
 0xd3e   :  { %v1977_v52 = vmul.f32 %v1964_v47, %v3655_v16  ;;  %v1986_v2 = vmul.f32 %v1982_v50, %v1982_v50 }
 0xd40   :  { %v1981_v56 = vadd.f32 %v1977_v52, %v3648_v12  ;;  %v1994_v4 = vsel %vm713_vm2, %v1986_v2, 0.0 }
 0xd41   :  { %v1959_v11 = vpop.permute.xlu0 %1958  ;;  %1995 = vadd.xlane.f32.xlu0 %v1994_v4 }
 0xd42   :  { %v1976_v62 = vmul.f32 %v1959_v11, %v3667_v18  ;;  %v1985_v5 = vmul.f32 %v1981_v56, %v1981_v56 }
 0xd44   :  { %v1980_v17 = vadd.f32 %v1976_v62, %v3661_v14  ;;  %v1991_v54 = vsel %vm713_vm2, %v1985_v5, 0.0 }
 0xd45   :  { %1992 = vadd.xlane.f32.xlu0 %v1991_v54 }
 0xd46   :  { %v1984_v6 = vmul.f32 %v1980_v17, %v1980_v17 }
 0xd48   :  { %v1988_v7 = vsel %vm713_vm2, %v1984_v6, 0.0  ;;  %vm2750_vm2 = vmmov 0  }
 0xd49   :  { %1989 = vadd.xlane.f32.xlu1 %v1988_v7  ;;  %2474 = vmatprep.mubr.msk.f32.mxu0 %vm2750_vm2, %v2749_v32 }
 0xdc6   :  { %v1999_v16 = vpop.xlane.xlu1 %1998 }
 0xdc7   :  { %v2003_v8 = vmul.f32 0.5, %v1999_v16 }
 0xdc9   :  { %v2007_v9 = vsub.f32 -14.703016, %v2003_v8 }
 0xdca   :  { %v1996_v12 = vpop.xlane.xlu0 %1995 }
 0xdcb   :  { %v2011_v10 = vadd.f32 %v2007_v9, %v1955_v43  ;;  %v2002_v19 = vmul.f32 0.5, %v1996_v12  ;;  %v2023_v43 = vld [vmem:[%s3744_s13 + $0x18] sm:$0xff] }
 0xdcd   :  { %v2018_v20 = vmul.f32 1.442695, %v2011_v10  ;;  %v2006_v21 = vsub.f32 -14.703016, %v2002_v19 }
 0xdce   :  { %v1993_v22 = vpop.xlane.xlu0 %1992 }
 0xdcf   :  { %2740 = vpow2.f32 %v2018_v20  ;;  %v2010_v18 = vadd.f32 %v2006_v21, %v1954_v60  ;;  %v2001_v23 = vmul.f32 0.5, %v1993_v22 }
 0xdd1   :  { %v2016_v14 = vmul.f32 1.442695, %v2010_v18  ;;  %v2005_v24 = vsub.f32 -14.703016, %v2001_v23 }
 0xdd2   :  { %v1990_v25 = vpop.xlane.xlu1 %1989 }
 0xdd3   :  { %2742 = vpow2.f32 %v2016_v14  ;;  %v2009_v26 = vadd.f32 %v2005_v24, %v1953_v41  ;;  %v2000_v27 = vmul.f32 0.5, %v1990_v25 }
 0xdd5   :  { %v2014_v28 = vmul.f32 1.442695, %v2009_v26  ;;  %v2004_v29 = vsub.f32 -14.703016, %v2000_v27 }
 0xdd7   :  { %2744 = vpow2.f32 %v2014_v28  ;;  %v2008_v30 = vadd.f32 %v2004_v29, %v1952_v3 }
 0xdd9   :  { %v2012_v31 = vmul.f32 1.442695, %v2008_v30 }
 0xddb   :  { %2746 = vpow2.f32 %v2012_v31 }
 0xddc   :  { %v2741_v33 = vpop.eup %2740 }
 0xddd   :  { %2041 = vperm.xlu0 %2480, %v2741_v33  }
 0xde0   :  { %v2743_v34 = vpop.eup %2742 }
 0xde1   :  { %2036 = vperm.xlu1 %2481, %v2743_v34  }
 0xde4   :  { %v2745_v35 = vpop.eup %2744 }
 0xde5   :  { %2031 = vperm.xlu1 %2481, %v2745_v35  }
 0xde8   :  { %v2747_v36 = vpop.eup %2746 }
 0xde9   :  { %2026 = vperm.xlu0 %2480, %v2747_v36  }
 0xe58   :  { %v2042_v46 = vpop.permute.xlu0 %2041 }
 0xe59   :  { %v2047_v49 = vmul.f32 %v2042_v46, %v2023_v43 }
 0xe5b   :  { %2467 = vmatpush3.msra.mxu0 %v2047_v49 }
 0xe5c   :  { %v2037_v37 = vpop.permute.xlu1 %2036  ;;  %2468 = vmatprep.subr.mxu0 %v2749_v32 }
 0xe5d   :  { %v2046_v53 = vmul.f32 %v2037_v37, %v2022_v44 }
 0xe5f   :  { %2469 = vmatpush3.msra.mxu0 %v2046_v53 }
 0xe60   :  { %v2032_v60 = vpop.permute.xlu1 %2031  ;;  %2470 = vmatprep.subr.mxu0 %v2749_v32 }
 0xe61   :  { %v2045_v63 = vmul.f32 %v2032_v60, %v2021_v39 }
 0xe63   :  { %2471 = vmatpush3.msra.mxu0 %v2045_v63 }
 0xe64   :  { %v2027_v40 = vpop.permute.xlu0 %2026  ;;  %2472 = vmatprep.subr.mxu0 %v2749_v32 }
 0xe65   :  { %v2044_v42 = vmul.f32 %v2027_v40, %v2020_v48 }
 0xe67   :  { %2473 = vmatpush3.msra.mxu0 %v2044_v42 }
 0xe68   :  { %2475 = vmatmul.mubr.msk.f32.vlgmr.msra.gmra.mxu0 %vm77_vm0, %v2048_v58 }
 0xf28   :  { %v2118_v61 = vpop.f32.mrf.mxu0 }
 0xf29   :  { %v2119_v41 = vadd.f32 1.0, %v2118_v61 }
 0xf2a   :  { %v2476_v51 = vpop.f32.mrf.mxu0 }
 0xf2b   :  { %2122 = vst [vmem:[%s3746_s15] sm:$0xff] %v2119_v41 }

</bundles_post_ra>
